<compile_context>
chip_gen: v7x
topology: tpu7x:2x2x1
jax: 0.10.0
libtpu: 0.0.40
codegen_flags: <defaults>
</compile_context>

<pallas_src>
import functools

import jax
import jax.numpy as jnp
from jax import lax
from jax.experimental import pallas as pl
from jax.experimental.pallas import tpu as pltpu


def _conv_lrelu_kernel(p_ref, w_ref, b_ref, o_ref, patch_ref, *, th, wo, cin,
                       negative_slope):
    """One (image, output-row-tile) per grid step.

    p_ref:     (2, 2, TH+1, Wo+1, Cin)  stride-2 phases of the padded input (bf16)
    w_ref:     (Cout, 16*Cin)           weights, K index = (kh*4+kw)*Cin + c (bf16)
    b_ref:     (Cout, 1)                bias (f32)
    o_ref:     (Cout, TH*Wo)            output tile (NCHW-flattened spatial)
    patch_ref: (TH*Wo, 16*Cin)          VMEM im2col scratch (bf16)
    """
    m = th * wo
    # Build the im2col patch matrix in VMEM: with stride 2, the (kh, kw) tap
    # over every output pixel of this row tile is phase (kh%2, kw%2) shifted
    # by (kh//2, kw//2) -- a contiguous static window.  One copy per tap.
    for kh in range(4):
        for kw in range(4):
            ph, ih = kh % 2, kh // 2
            pw, iw = kw % 2, kw // 2
            slab = p_ref[ph, pw, ih:ih + th, iw:iw + wo, :]       # (TH, Wo, Cin)
            k0 = (kh * 4 + kw) * cin
            patch_ref[:, k0:k0 + cin] = slab.reshape(m, cin)

    # Single big-K GEMM on the MXU: (Cout, K) . (M, K)^T -> (Cout, M), f32 acc.
    acc = lax.dot_general(
        w_ref[...], patch_ref[...],
        dimension_numbers=(((1,), (1,)), ((), ())),
        preferred_element_type=jnp.float32)
    acc = acc + b_ref[...]                                        # (Cout, 1) broadcast
    o_ref[...] = jnp.where(acc >= 0, acc, negative_slope * acc).astype(o_ref.dtype)


def _pick_row_tile(ho, wo, max_m=4096):
    """Output rows per grid step: whole image if small, else the largest
    divisor of Ho whose M tile (rows*Wo) is lane-aligned and <= max_m."""
    if ho * wo <= max_m:
        return ho
    for th in range(ho, 0, -1):
        if ho % th == 0 and th * wo <= max_m and (th * wo) % 128 == 0:
            return th
    return ho


def _vmem_limit_bytes():
    phys = 64 * 1024 * 1024            # conservative default (v7x physical)
    try:
        phys = int(pltpu.get_tpu_info().vmem_capacity_bytes)
    except Exception:
        pass
    # 3/4 of physical: 48 MiB on v7x (64 MiB), 96 MiB on v5e/v6e (128 MiB).
    return max(32 * 1024 * 1024, min(phys * 3 // 4, 112 * 1024 * 1024))


def encoder_forward(x_nchw, weight_oihw, bias, *, negative_slope=0.2,
                    compute_dtype=jnp.bfloat16):
    """Conv2d(kernel=4, stride=2, padding=1) + LeakyReLU(negative_slope).

    x_nchw:      (N, Cin, H, W)      (PyTorch layout, H and W even)
    weight_oihw: (Cout, Cin, 4, 4)   (PyTorch layout)
    bias:        (Cout,)
    returns:     (N, Cout, H//2, W//2)
    """
    N, Cin, H, W = x_nchw.shape
    Cout = weight_oihw.shape[0]
    # TODO(synk): odd H/W (PyTorch gives floor((H-2)/2)+1) is unsupported by
    # the stride-2 phase decomposition; even spatial sizes only.
    assert H % 2 == 0 and W % 2 == 0, "stride-2 / pad-1 / k-4 conv expects even H, W"
    Ho, Wo = H // 2, W // 2
    A, B = Ho + 1, Wo + 1            # rows/cols per spatial phase of the padded input
    out_dtype = x_nchw.dtype

    TH = _pick_row_tile(Ho, Wo)
    n_t = Ho // TH

    # --- wrapper-side layout: pad + space-to-depth (stride-2 phases), bf16 ---
    # TODO(synk): this relayout is one extra HBM read+write of the input; in a
    # full encoder stack keep activations in the phase layout between layers
    # (or fold it into the kernel via manual DMA) so it is paid only once.
    xb = x_nchw.astype(compute_dtype)
    xp = jnp.pad(xb, ((0, 0), (0, 0), (1, 1), (1, 1)))            # (N, Cin, H+2, W+2)
    # phases[n, p, q, a, b, c] = x_pad[n, c, 2a+p, 2b+q]
    phases = jnp.transpose(xp.reshape(N, Cin, A, 2, B, 2),
                           (0, 3, 5, 2, 4, 1))                    # (N, 2, 2, A, B, Cin)
    # Row tiles with a one-row halo (taps kh>=2 of output row r read phase row r+1).
    if n_t == 1:
        phases_t = phases[:, None]                                # (N, 1, 2, 2, A, B, Cin)
    else:
        phases_t = jnp.stack(
            [phases[:, :, :, t * TH:t * TH + TH + 1] for t in range(n_t)],
            axis=1)                                               # (N, n_t, 2, 2, TH+1, B, Cin)

    # Weights -> (Cout, 16*Cin) with K index (kh*4+kw)*Cin + c ; bias -> (Cout, 1).
    w2 = jnp.transpose(weight_oihw, (0, 2, 3, 1)).reshape(Cout, 16 * Cin)
    w2 = w2.astype(compute_dtype)
    b2 = bias.reshape(Cout, 1).astype(jnp.float32)

    kernel = functools.partial(_conv_lrelu_kernel, th=TH, wo=Wo, cin=Cin,
                               negative_slope=negative_slope)

    flops = 2 * N * Ho * Wo * Cout * 16 * Cin
    bytes_accessed = (phases_t.size * phases_t.dtype.itemsize
                      + w2.size * w2.dtype.itemsize + b2.size * 4
                      + N * Cout * Ho * Wo * jnp.dtype(out_dtype).itemsize)

    out = pl.pallas_call(
        kernel,
        out_shape=jax.ShapeDtypeStruct((N, Cout, Ho * Wo), out_dtype),
        grid_spec=pltpu.PrefetchScalarGridSpec(
            num_scalar_prefetch=0,
            grid=(N, n_t),                                        # image x row-tile
            in_specs=[
                # one row tile of phases per step (auto double-buffered DMA)
                pl.BlockSpec((None, None, 2, 2, TH + 1, B, Cin),
                             lambda n, t: (n, t, 0, 0, 0, 0, 0)),
                # weights + bias: constant index map -> fetched once, stay resident.
                # TODO(synk): pipeline_mode=pl.Buffered(1) here would also drop
                # the second (never refetched) weight buffer on VMEM-tight v7x.
                pl.BlockSpec((Cout, 16 * Cin), lambda n, t: (0, 0)),
                pl.BlockSpec((Cout, 1), lambda n, t: (0, 0)),
            ],
            out_specs=pl.BlockSpec((None, Cout, TH * Wo), lambda n, t: (n, 0, t)),
            scratch_shapes=[pltpu.VMEM((TH * Wo, 16 * Cin), compute_dtype)],
        ),
        compiler_params=pltpu.CompilerParams(
            dimension_semantics=("parallel", "parallel"),
            vmem_limit_bytes=_vmem_limit_bytes(),
        ),
        cost_estimate=pl.CostEstimate(flops=flops, transcendentals=0,
                                      bytes_accessed=bytes_accessed),
    )(phases_t, w2, b2)

    # (N, Cout, Ho*Wo) is already NCHW-flattened: the final reshape is free
    # (no transpose, no extra HBM pass).
    return out.reshape(N, Cout, Ho, Wo)


if __name__ == "__main__":
    key = jax.random.PRNGKey(0)
    k_x, k_w, k_b = jax.random.split(key, 3)

    N, Cin, H, W = 2, 4, 16, 16
    Cout = 8

    x = jax.random.normal(k_x, (N, Cin, H, W), dtype=jnp.float32)
    fan_in = Cin * 4 * 4
    bound = 1.0 / (fan_in ** 0.5)
    w = jax.random.uniform(k_w, (Cout, Cin, 4, 4), minval=-bound, maxval=bound,
                           dtype=jnp.float32)
    b = jax.random.uniform(k_b, (Cout,), minval=-bound, maxval=bound,
                           dtype=jnp.float32)

    y = jax.block_until_ready(encoder_forward(x, w, b))
    assert y.shape == (N, Cout, H // 2, W // 2)
    assert y.dtype == x.dtype

    # Reference 1: same bf16-quantized operands through XLA's conv (tight tol).
    xq = x.astype(jnp.bfloat16)
    wq = w.astype(jnp.bfloat16)
    ref = lax.conv_general_dilated(
        xq, wq, window_strides=(2, 2), padding=((1, 1), (1, 1)),
        dimension_numbers=("NCHW", "OIHW", "NCHW"),
        preferred_element_type=jnp.float32)
    ref = ref + b.reshape(1, Cout, 1, 1)
    ref = jnp.where(ref >= 0, ref, 0.2 * ref)
    assert jnp.allclose(y, ref, atol=1e-3, rtol=1e-3)

    # Reference 2: full-f32 conv (loose tol: kernel streams bf16 inputs/weights).
    ref32 = lax.conv_general_dilated(
        x, w, window_strides=(2, 2), padding=((1, 1), (1, 1)),
        dimension_numbers=("NCHW", "OIHW", "NCHW"))
    ref32 = ref32 + b.reshape(1, Cout, 1, 1)
    ref32 = jnp.where(ref32 >= 0, ref32, 0.2 * ref32)
    assert jnp.allclose(y, ref32, atol=3e-2, rtol=3e-2)

    print("KERNEL_OK")
</pallas_src>

<mosaic_0001>
module attributes {stable_mosaic.version = 11 : i64} {
  func.func @_conv_lrelu_kernel(%arg0: i32, %arg1: i32, %arg2: memref<1x1x2x2x9x9x4xbf16, #tpu.memory_space<vmem>>, %arg3: memref<8x64xbf16, #tpu.memory_space<vmem>>, %arg4: memref<8x1xf32, #tpu.memory_space<vmem>>, %arg5: memref<1x8x64xf32, #tpu.memory_space<vmem>>, %arg6: memref<64x64xbf16, #tpu.memory_space<vmem>>) attributes {dimension_semantics = [#tpu.dimension_semantics<parallel>, #tpu.dimension_semantics<parallel>], iteration_bounds = array<i64: 2, 1>, scalar_prefetch = 0 : i64, scratch_operands = 1 : i64, tpu.core_type = #tpu.core_type<tc>, window_params = [{transform_indices = @transform_0, window_bounds = array<i64: 1, 1, 2, 2, 9, 9, 4>}, {pipeline_mode = #tpu.pipeline_mode<synchronous>, transform_indices = @transform_1, window_bounds = array<i64: 8, 64>}, {pipeline_mode = #tpu.pipeline_mode<synchronous>, transform_indices = @transform_2, window_bounds = array<i64: 8, 1>}, {transform_indices = @transform_3, window_bounds = array<i64: 1, 8, 64>}]} {
    %c0 = arith.constant 0 : index
    %c0_0 = arith.constant 0 : index
    %c0_1 = arith.constant 0 : index
    %c0_2 = arith.constant 0 : index
    %c0_3 = arith.constant 0 : index
    %c0_4 = arith.constant 0 : index
    %c0_5 = arith.constant 0 : index
    %0 = vector.load %arg2[%c0, %c0_0, %c0_1, %c0_2, %c0_3, %c0_4, %c0_5] : memref<1x1x2x2x9x9x4xbf16, #tpu.memory_space<vmem>>, vector<1x1x1x1x8x8x4xbf16>
    %1 = vector.shape_cast %0 : vector<1x1x1x1x8x8x4xbf16> to vector<8x8x4xbf16>
    %2 = vector.shape_cast %1 : vector<8x8x4xbf16> to vector<64x4xbf16>
    %c0_6 = arith.constant 0 : index
    %c0_7 = arith.constant 0 : index
    %3 = vector.load %arg6[%c0_6, %c0_7] : memref<64x64xbf16, #tpu.memory_space<vmem>>, vector<64x4xbf16>
    tpu.vector_store %arg6[%c0_6, %c0_7], %2 {strides = array<i32>} : memref<64x64xbf16, #tpu.memory_space<vmem>>, vector<64x4xbf16>,
    %c0_8 = arith.constant 0 : index
    %c0_9 = arith.constant 0 : index
    %c0_10 = arith.constant 0 : index
    %c1 = arith.constant 1 : index
    %c0_11 = arith.constant 0 : index
    %c0_12 = arith.constant 0 : index
    %c0_13 = arith.constant 0 : index
    %4 = vector.load %arg2[%c0_8, %c0_9, %c0_10, %c1, %c0_11, %c0_12, %c0_13] : memref<1x1x2x2x9x9x4xbf16, #tpu.memory_space<vmem>>, vector<1x1x1x1x8x8x4xbf16>
    %5 = vector.shape_cast %4 : vector<1x1x1x1x8x8x4xbf16> to vector<8x8x4xbf16>
    %6 = vector.shape_cast %5 : vector<8x8x4xbf16> to vector<64x4xbf16>
    %c0_14 = arith.constant 0 : index
    %c4 = arith.constant 4 : index
    %7 = vector.load %arg6[%c0_14, %c4] : memref<64x64xbf16, #tpu.memory_space<vmem>>, vector<64x4xbf16>
    tpu.vector_store %arg6[%c0_14, %c4], %6 {strides = array<i32>} : memref<64x64xbf16, #tpu.memory_space<vmem>>, vector<64x4xbf16>,
    %c0_15 = arith.constant 0 : index
    %c0_16 = arith.constant 0 : index
    %c0_17 = arith.constant 0 : index
    %c0_18 = arith.constant 0 : index
    %c0_19 = arith.constant 0 : index
    %c1_20 = arith.constant 1 : index
    %c0_21 = arith.constant 0 : index
    %8 = vector.load %arg2[%c0_15, %c0_16, %c0_17, %c0_18, %c0_19, %c1_20, %c0_21] : memref<1x1x2x2x9x9x4xbf16, #tpu.memory_space<vmem>>, vector<1x1x1x1x8x8x4xbf16>
    %9 = vector.shape_cast %8 : vector<1x1x1x1x8x8x4xbf16> to vector<8x8x4xbf16>
    %10 = vector.shape_cast %9 : vector<8x8x4xbf16> to vector<64x4xbf16>
    %c0_22 = arith.constant 0 : index
    %c8 = arith.constant 8 : index
    %11 = vector.load %arg6[%c0_22, %c8] : memref<64x64xbf16, #tpu.memory_space<vmem>>, vector<64x4xbf16>
    tpu.vector_store %arg6[%c0_22, %c8], %10 {strides = array<i32>} : memref<64x64xbf16, #tpu.memory_space<vmem>>, vector<64x4xbf16>,
    %c0_23 = arith.constant 0 : index
    %c0_24 = arith.constant 0 : index
    %c0_25 = arith.constant 0 : index
    %c1_26 = arith.constant 1 : index
    %c0_27 = arith.constant 0 : index
    %c1_28 = arith.constant 1 : index
    %c0_29 = arith.constant 0 : index
    %12 = vector.load %arg2[%c0_23, %c0_24, %c0_25, %c1_26, %c0_27, %c1_28, %c0_29] : memref<1x1x2x2x9x9x4xbf16, #tpu.memory_space<vmem>>, vector<1x1x1x1x8x8x4xbf16>
    %13 = vector.shape_cast %12 : vector<1x1x1x1x8x8x4xbf16> to vector<8x8x4xbf16>
    %14 = vector.shape_cast %13 : vector<8x8x4xbf16> to vector<64x4xbf16>
    %c0_30 = arith.constant 0 : index
    %c12 = arith.constant 12 : index
    %15 = vector.load %arg6[%c0_30, %c12] : memref<64x64xbf16, #tpu.memory_space<vmem>>, vector<64x4xbf16>
    tpu.vector_store %arg6[%c0_30, %c12], %14 {strides = array<i32>} : memref<64x64xbf16, #tpu.memory_space<vmem>>, vector<64x4xbf16>,
    %c0_31 = arith.constant 0 : index
    %c0_32 = arith.constant 0 : index
    %c1_33 = arith.constant 1 : index
    %c0_34 = arith.constant 0 : index
    %c0_35 = arith.constant 0 : index
    %c0_36 = arith.constant 0 : index
    %c0_37 = arith.constant 0 : index
    %16 = vector.load %arg2[%c0_31, %c0_32, %c1_33, %c0_34, %c0_35, %c0_36, %c0_37] : memref<1x1x2x2x9x9x4xbf16, #tpu.memory_space<vmem>>, vector<1x1x1x1x8x8x4xbf16>
    %17 = vector.shape_cast %16 : vector<1x1x1x1x8x8x4xbf16> to vector<8x8x4xbf16>
    %18 = vector.shape_cast %17 : vector<8x8x4xbf16> to vector<64x4xbf16>
    %c0_38 = arith.constant 0 : index
    %c16 = arith.constant 16 : index
    %19 = vector.load %arg6[%c0_38, %c16] : memref<64x64xbf16, #tpu.memory_space<vmem>>, vector<64x4xbf16>
    tpu.vector_store %arg6[%c0_38, %c16], %18 {strides = array<i32>} : memref<64x64xbf16, #tpu.memory_space<vmem>>, vector<64x4xbf16>,
    %c0_39 = arith.constant 0 : index
    %c0_40 = arith.constant 0 : index
    %c1_41 = arith.constant 1 : index
    %c1_42 = arith.constant 1 : index
    %c0_43 = arith.constant 0 : index
    %c0_44 = arith.constant 0 : index
    %c0_45 = arith.constant 0 : index
    %20 = vector.load %arg2[%c0_39, %c0_40, %c1_41, %c1_42, %c0_43, %c0_44, %c0_45] : memref<1x1x2x2x9x9x4xbf16, #tpu.memory_space<vmem>>, vector<1x1x1x1x8x8x4xbf16>
    %21 = vector.shape_cast %20 : vector<1x1x1x1x8x8x4xbf16> to vector<8x8x4xbf16>
    %22 = vector.shape_cast %21 : vector<8x8x4xbf16> to vector<64x4xbf16>
    %c0_46 = arith.constant 0 : index
    %c20 = arith.constant 20 : index
    %23 = vector.load %arg6[%c0_46, %c20] : memref<64x64xbf16, #tpu.memory_space<vmem>>, vector<64x4xbf16>
    tpu.vector_store %arg6[%c0_46, %c20], %22 {strides = array<i32>} : memref<64x64xbf16, #tpu.memory_space<vmem>>, vector<64x4xbf16>,
    %c0_47 = arith.constant 0 : index
    %c0_48 = arith.constant 0 : index
    %c1_49 = arith.constant 1 : index
    %c0_50 = arith.constant 0 : index
    %c0_51 = arith.constant 0 : index
    %c1_52 = arith.constant 1 : index
    %c0_53 = arith.constant 0 : index
    %24 = vector.load %arg2[%c0_47, %c0_48, %c1_49, %c0_50, %c0_51, %c1_52, %c0_53] : memref<1x1x2x2x9x9x4xbf16, #tpu.memory_space<vmem>>, vector<1x1x1x1x8x8x4xbf16>
    %25 = vector.shape_cast %24 : vector<1x1x1x1x8x8x4xbf16> to vector<8x8x4xbf16>
    %26 = vector.shape_cast %25 : vector<8x8x4xbf16> to vector<64x4xbf16>
    %c0_54 = arith.constant 0 : index
    %c24 = arith.constant 24 : index
    %27 = vector.load %arg6[%c0_54, %c24] : memref<64x64xbf16, #tpu.memory_space<vmem>>, vector<64x4xbf16>
    tpu.vector_store %arg6[%c0_54, %c24], %26 {strides = array<i32>} : memref<64x64xbf16, #tpu.memory_space<vmem>>, vector<64x4xbf16>,
    %c0_55 = arith.constant 0 : index
    %c0_56 = arith.constant 0 : index
    %c1_57 = arith.constant 1 : index
    %c1_58 = arith.constant 1 : index
    %c0_59 = arith.constant 0 : index
    %c1_60 = arith.constant 1 : index
    %c0_61 = arith.constant 0 : index
    %28 = vector.load %arg2[%c0_55, %c0_56, %c1_57, %c1_58, %c0_59, %c1_60, %c0_61] : memref<1x1x2x2x9x9x4xbf16, #tpu.memory_space<vmem>>, vector<1x1x1x1x8x8x4xbf16>
    %29 = vector.shape_cast %28 : vector<1x1x1x1x8x8x4xbf16> to vector<8x8x4xbf16>
    %30 = vector.shape_cast %29 : vector<8x8x4xbf16> to vector<64x4xbf16>
    %c0_62 = arith.constant 0 : index
    %c28 = arith.constant 28 : index
    %31 = vector.load %arg6[%c0_62, %c28] : memref<64x64xbf16, #tpu.memory_space<vmem>>, vector<64x4xbf16>
    tpu.vector_store %arg6[%c0_62, %c28], %30 {strides = array<i32>} : memref<64x64xbf16, #tpu.memory_space<vmem>>, vector<64x4xbf16>,
    %c0_63 = arith.constant 0 : index
    %c0_64 = arith.constant 0 : index
    %c0_65 = arith.constant 0 : index
    %c0_66 = arith.constant 0 : index
    %c1_67 = arith.constant 1 : index
    %c0_68 = arith.constant 0 : index
    %c0_69 = arith.constant 0 : index
    %32 = vector.load %arg2[%c0_63, %c0_64, %c0_65, %c0_66, %c1_67, %c0_68, %c0_69] : memref<1x1x2x2x9x9x4xbf16, #tpu.memory_space<vmem>>, vector<1x1x1x1x8x8x4xbf16>
    %33 = vector.shape_cast %32 : vector<1x1x1x1x8x8x4xbf16> to vector<8x8x4xbf16>
    %34 = vector.shape_cast %33 : vector<8x8x4xbf16> to vector<64x4xbf16>
    %c0_70 = arith.constant 0 : index
    %c32 = arith.constant 32 : index
    %35 = vector.load %arg6[%c0_70, %c32] : memref<64x64xbf16, #tpu.memory_space<vmem>>, vector<64x4xbf16>
    tpu.vector_store %arg6[%c0_70, %c32], %34 {strides = array<i32>} : memref<64x64xbf16, #tpu.memory_space<vmem>>, vector<64x4xbf16>,
    %c0_71 = arith.constant 0 : index
    %c0_72 = arith.constant 0 : index
    %c0_73 = arith.constant 0 : index
    %c1_74 = arith.constant 1 : index
    %c1_75 = arith.constant 1 : index
    %c0_76 = arith.constant 0 : index
    %c0_77 = arith.constant 0 : index
    %36 = vector.load %arg2[%c0_71, %c0_72, %c0_73, %c1_74, %c1_75, %c0_76, %c0_77] : memref<1x1x2x2x9x9x4xbf16, #tpu.memory_space<vmem>>, vector<1x1x1x1x8x8x4xbf16>
    %37 = vector.shape_cast %36 : vector<1x1x1x1x8x8x4xbf16> to vector<8x8x4xbf16>
    %38 = vector.shape_cast %37 : vector<8x8x4xbf16> to vector<64x4xbf16>
    %c0_78 = arith.constant 0 : index
    %c36 = arith.constant 36 : index
    %39 = vector.load %arg6[%c0_78, %c36] : memref<64x64xbf16, #tpu.memory_space<vmem>>, vector<64x4xbf16>
    tpu.vector_store %arg6[%c0_78, %c36], %38 {strides = array<i32>} : memref<64x64xbf16, #tpu.memory_space<vmem>>, vector<64x4xbf16>,
    %c0_79 = arith.constant 0 : index
    %c0_80 = arith.constant 0 : index
    %c0_81 = arith.constant 0 : index
    %c0_82 = arith.constant 0 : index
    %c1_83 = arith.constant 1 : index
    %c1_84 = arith.constant 1 : index
    %c0_85 = arith.constant 0 : index
    %40 = vector.load %arg2[%c0_79, %c0_80, %c0_81, %c0_82, %c1_83, %c1_84, %c0_85] : memref<1x1x2x2x9x9x4xbf16, #tpu.memory_space<vmem>>, vector<1x1x1x1x8x8x4xbf16>
    %41 = vector.shape_cast %40 : vector<1x1x1x1x8x8x4xbf16> to vector<8x8x4xbf16>
    %42 = vector.shape_cast %41 : vector<8x8x4xbf16> to vector<64x4xbf16>
    %c0_86 = arith.constant 0 : index
    %c40 = arith.constant 40 : index
    %43 = vector.load %arg6[%c0_86, %c40] : memref<64x64xbf16, #tpu.memory_space<vmem>>, vector<64x4xbf16>
    tpu.vector_store %arg6[%c0_86, %c40], %42 {strides = array<i32>} : memref<64x64xbf16, #tpu.memory_space<vmem>>, vector<64x4xbf16>,
    %c0_87 = arith.constant 0 : index
    %c0_88 = arith.constant 0 : index
    %c0_89 = arith.constant 0 : index
    %c1_90 = arith.constant 1 : index
    %c1_91 = arith.constant 1 : index
    %c1_92 = arith.constant 1 : index
    %c0_93 = arith.constant 0 : index
    %44 = vector.load %arg2[%c0_87, %c0_88, %c0_89, %c1_90, %c1_91, %c1_92, %c0_93] : memref<1x1x2x2x9x9x4xbf16, #tpu.memory_space<vmem>>, vector<1x1x1x1x8x8x4xbf16>
    %45 = vector.shape_cast %44 : vector<1x1x1x1x8x8x4xbf16> to vector<8x8x4xbf16>
    %46 = vector.shape_cast %45 : vector<8x8x4xbf16> to vector<64x4xbf16>
    %c0_94 = arith.constant 0 : index
    %c44 = arith.constant 44 : index
    %47 = vector.load %arg6[%c0_94, %c44] : memref<64x64xbf16, #tpu.memory_space<vmem>>, vector<64x4xbf16>
    tpu.vector_store %arg6[%c0_94, %c44], %46 {strides = array<i32>} : memref<64x64xbf16, #tpu.memory_space<vmem>>, vector<64x4xbf16>,
    %c0_95 = arith.constant 0 : index
    %c0_96 = arith.constant 0 : index
    %c1_97 = arith.constant 1 : index
    %c0_98 = arith.constant 0 : index
    %c1_99 = arith.constant 1 : index
    %c0_100 = arith.constant 0 : index
    %c0_101 = arith.constant 0 : index
    %48 = vector.load %arg2[%c0_95, %c0_96, %c1_97, %c0_98, %c1_99, %c0_100, %c0_101] : memref<1x1x2x2x9x9x4xbf16, #tpu.memory_space<vmem>>, vector<1x1x1x1x8x8x4xbf16>
    %49 = vector.shape_cast %48 : vector<1x1x1x1x8x8x4xbf16> to vector<8x8x4xbf16>
    %50 = vector.shape_cast %49 : vector<8x8x4xbf16> to vector<64x4xbf16>
    %c0_102 = arith.constant 0 : index
    %c48 = arith.constant 48 : index
    %51 = vector.load %arg6[%c0_102, %c48] : memref<64x64xbf16, #tpu.memory_space<vmem>>, vector<64x4xbf16>
    tpu.vector_store %arg6[%c0_102, %c48], %50 {strides = array<i32>} : memref<64x64xbf16, #tpu.memory_space<vmem>>, vector<64x4xbf16>,
    %c0_103 = arith.constant 0 : index
    %c0_104 = arith.constant 0 : index
    %c1_105 = arith.constant 1 : index
    %c1_106 = arith.constant 1 : index
    %c1_107 = arith.constant 1 : index
    %c0_108 = arith.constant 0 : index
    %c0_109 = arith.constant 0 : index
    %52 = vector.load %arg2[%c0_103, %c0_104, %c1_105, %c1_106, %c1_107, %c0_108, %c0_109] : memref<1x1x2x2x9x9x4xbf16, #tpu.memory_space<vmem>>, vector<1x1x1x1x8x8x4xbf16>
    %53 = vector.shape_cast %52 : vector<1x1x1x1x8x8x4xbf16> to vector<8x8x4xbf16>
    %54 = vector.shape_cast %53 : vector<8x8x4xbf16> to vector<64x4xbf16>
    %c0_110 = arith.constant 0 : index
    %c52 = arith.constant 52 : index
    %55 = vector.load %arg6[%c0_110, %c52] : memref<64x64xbf16, #tpu.memory_space<vmem>>, vector<64x4xbf16>
    tpu.vector_store %arg6[%c0_110, %c52], %54 {strides = array<i32>} : memref<64x64xbf16, #tpu.memory_space<vmem>>, vector<64x4xbf16>,
    %c0_111 = arith.constant 0 : index
    %c0_112 = arith.constant 0 : index
    %c1_113 = arith.constant 1 : index
    %c0_114 = arith.constant 0 : index
    %c1_115 = arith.constant 1 : index
    %c1_116 = arith.constant 1 : index
    %c0_117 = arith.constant 0 : index
    %56 = vector.load %arg2[%c0_111, %c0_112, %c1_113, %c0_114, %c1_115, %c1_116, %c0_117] : memref<1x1x2x2x9x9x4xbf16, #tpu.memory_space<vmem>>, vector<1x1x1x1x8x8x4xbf16>
    %57 = vector.shape_cast %56 : vector<1x1x1x1x8x8x4xbf16> to vector<8x8x4xbf16>
    %58 = vector.shape_cast %57 : vector<8x8x4xbf16> to vector<64x4xbf16>
    %c0_118 = arith.constant 0 : index
    %c56 = arith.constant 56 : index
    %59 = vector.load %arg6[%c0_118, %c56] : memref<64x64xbf16, #tpu.memory_space<vmem>>, vector<64x4xbf16>
    tpu.vector_store %arg6[%c0_118, %c56], %58 {strides = array<i32>} : memref<64x64xbf16, #tpu.memory_space<vmem>>, vector<64x4xbf16>,
    %c0_119 = arith.constant 0 : index
    %c0_120 = arith.constant 0 : index
    %c1_121 = arith.constant 1 : index
    %c1_122 = arith.constant 1 : index
    %c1_123 = arith.constant 1 : index
    %c1_124 = arith.constant 1 : index
    %c0_125 = arith.constant 0 : index
    %60 = vector.load %arg2[%c0_119, %c0_120, %c1_121, %c1_122, %c1_123, %c1_124, %c0_125] : memref<1x1x2x2x9x9x4xbf16, #tpu.memory_space<vmem>>, vector<1x1x1x1x8x8x4xbf16>
    %61 = vector.shape_cast %60 : vector<1x1x1x1x8x8x4xbf16> to vector<8x8x4xbf16>
    %62 = vector.shape_cast %61 : vector<8x8x4xbf16> to vector<64x4xbf16>
    %c0_126 = arith.constant 0 : index
    %c60 = arith.constant 60 : index
    %63 = vector.load %arg6[%c0_126, %c60] : memref<64x64xbf16, #tpu.memory_space<vmem>>, vector<64x4xbf16>
    tpu.vector_store %arg6[%c0_126, %c60], %62 {strides = array<i32>} : memref<64x64xbf16, #tpu.memory_space<vmem>>, vector<64x4xbf16>,
    %c0_127 = arith.constant 0 : index
    %c0_128 = arith.constant 0 : index
    %64 = vector.load %arg3[%c0_127, %c0_128] : memref<8x64xbf16, #tpu.memory_space<vmem>>, vector<8x64xbf16>
    %c0_129 = arith.constant 0 : index
    %c0_130 = arith.constant 0 : index
    %65 = vector.load %arg6[%c0_129, %c0_130] : memref<64x64xbf16, #tpu.memory_space<vmem>>, vector<64x64xbf16>
    %cst = arith.constant dense<0.000000e+00> : vector<8x64xf32>
    %66 = tpu.matmul %64, %65, %cst {dimension_numbers = #tpu.dot_dimension_numbers<[1], [1], [0], [0], [0, 0, 1, 0], [], []>} : vector<8x64xbf16>, vector<64x64xbf16>, vector<8x64xf32> -> vector<8x64xf32>
    %c0_131 = arith.constant 0 : index
    %c0_132 = arith.constant 0 : index
    %67 = vector.load %arg4[%c0_131, %c0_132] : memref<8x1xf32, #tpu.memory_space<vmem>>, vector<8x1xf32>
    %68 = vector.broadcast %67 : vector<8x1xf32> to vector<8x64xf32>
    %69 = arith.addf %66, %68 : vector<8x64xf32>
    %cst_133 = arith.constant 0.000000e+00 : f32
    %70 = vector.broadcast %cst_133 : f32 to vector<8x64xf32>
    %71 = arith.cmpf oge, %69, %70 : vector<8x64xf32>
    %cst_134 = arith.constant 2.000000e-01 : f32
    %72 = vector.broadcast %cst_134 : f32 to vector<8x64xf32>
    %73 = arith.mulf %72, %69 : vector<8x64xf32>
    %74 = arith.select %71, %69, %73 : vector<8x64xi1>, vector<8x64xf32>
    %c0_135 = arith.constant 0 : index
    %c0_136 = arith.constant 0 : index
    %c0_137 = arith.constant 0 : index
    %75 = vector.load %arg5[%c0_135, %c0_136, %c0_137] : memref<1x8x64xf32, #tpu.memory_space<vmem>>, vector<1x8x64xf32>
    %76 = vector.shape_cast %75 : vector<1x8x64xf32> to vector<8x64xf32>
    %77 = vector.shape_cast %74 : vector<8x64xf32> to vector<1x8x64xf32>
    tpu.vector_store %arg5[%c0_135, %c0_136, %c0_137], %77 {strides = array<i32>} : memref<1x8x64xf32, #tpu.memory_space<vmem>>, vector<1x8x64xf32>,
    return
  }
  func.func @transform_0(%arg0: i32, %arg1: i32) -> (i32, i32, i32, i32, i32, i32, i32) {
    %c0_i32 = arith.constant 0 : i32
    %c0_i32_0 = arith.constant 0 : i32
    %c0_i32_1 = arith.constant 0 : i32
    %c0_i32_2 = arith.constant 0 : i32
    %c0_i32_3 = arith.constant 0 : i32
    %c0_i32_4 = arith.constant 0 : i32
    return %arg0, %arg1, %c0_i32, %c0_i32_0, %c0_i32_1, %c0_i32_2, %c0_i32_3 : i32, i32, i32, i32, i32, i32, i32
  }
  func.func @transform_1(%arg0: i32, %arg1: i32) -> (i32, i32) {
    %c0_i32 = arith.constant 0 : i32
    %c0_i32_0 = arith.constant 0 : i32
    %c0_i32_1 = arith.constant 0 : i32
    return %c0_i32, %c0_i32_0 : i32, i32
  }
  func.func @transform_2(%arg0: i32, %arg1: i32) -> (i32, i32) {
    %c0_i32 = arith.constant 0 : i32
    %c0_i32_0 = arith.constant 0 : i32
    %c0_i32_1 = arith.constant 0 : i32
    return %c0_i32, %c0_i32_0 : i32, i32
  }
  func.func @transform_3(%arg0: i32, %arg1: i32) -> (i32, i32, i32) {
    %c0_i32 = arith.constant 0 : i32
    %c0_i32_0 = arith.constant 0 : i32
    return %arg0, %c0_i32, %arg1 : i32, i32, i32
  }
}

</mosaic_0001>

<bundles_post_ra>
// kernel: tpu_custom_call.1
= control target key start
LH: loop header
LB: loop body
LE: loop exit
PB: predicated region body
PF: predicated region fallthrough
CT: control target
= control target key end

     0   :  { %8 = vsyncpa [#allocation4], 0  ;;  %s3039_s0 = inlined_call_operand.vmem [shape: bf16[2,1,2,2,9,9,4], index: 0, kind: input, shape index: {}]   ;;  %s3040_s1 = inlined_call_operand.vmem [shape: bf16[8,64], index: 1, kind: input, shape index: {}]   ;;  %s3041_s2 = inlined_call_operand.vmem [shape: f32[8,1], index: 2, kind: input, shape index: {}]   ;;  %s3042_s3 = inlined_call_operand.hbm [shape: f32[2,8,64], index: 3, kind: output, shape index: {}]  }
   0x1   :  { %10 = vsyncpa [#allocation4 + $0x1], 0  ;;  %s2466_s12 = smov 0   ;;  %s2468_s13 = smov 0  }
   0x2   :  { %s2470_s14 = smov 0   ;;  %s2472_s15 = smov 0  }
   0x3   :  { %s2474_s16 = smov 0   ;;  %s2476_s17 = smov 0  }
   0x4 LB: > { %s1979_s18 = sadd.s32 4294967295, %s2425_s17   ;;  %s1980_s19 = sadd.s32 4294967294, %s2425_s17   ;;  %s2425_s17 = sphi %s2476_s17, %s16_s17   ;;  %s2421_s16 = sphi %s2474_s16, %s3051_s16   ;;  %s2417_s15 = sphi %s2472_s15, %s3050_s15   ;;  %s2413_s14 = sphi %s2470_s14, %s3049_s14   ;;  %s2409_s13 = sphi %s2468_s13, %s3048_s13   ;;  %s2405_s12 = sphi %s2466_s12, %s3047_s12  }
   0x5   : > { %s28_s20 = sadd.s32 1, %s2421_s16  ;;  %s107_s21 = sadd.s32 1, %s2413_s14 }
   0x6   : > { %p30_p0 = scmp.ge.s32.totalorder %s28_s20, 2  ;;  %p117_p1 = scmp.ne.s32.totalorder %s2413_s14, %s2409_s13 }
   0x7   : > { %p118_p2 = scmp.eq.s32.totalorder %s1979_s18, 1  ;;  %p123_p3 = scmp.ne.s32.totalorder %s2409_s13, %s2405_s12 }
   0x8   : > { %s3053_s20 = smov (%p30_p0, %s28_s20), 0  ;;  %p124_p5 = scmp.eq.s32.totalorder %s1980_s19, 1 }
   0x9   : > { %p2506_p4 = por %p118_p2, %p117_p1  ;;  %s102_s23 = ssub.s32 %s2421_s16, %s3053_s20 }
   0xa   : > { %p1983_p6 = scmp.ge.s32.totalorder %s2425_s17, 1  ;;  %p105_p7 = scmp.eq.s32.totalorder %s102_s23, 0 }
   0xb   : > { %p2513_p8 = por %p124_p5, %p123_p3  ;;  %p160_p9 = scmp.lt.s32.totalorder %s2425_s17, 3 }
   0xc   : > { %s2519_s25 = scalar_select %p105_p7, %s2413_s14, %s107_s21  }
   0xd   : > { %p161_p10 = pnand %p1983_p6, %p160_p9 }
   0xe   : > { %p188_p11 = scmp.lt.s32.totalorder (!%p161_p10), %s2417_s15, 1  ;;  %vm297_vm0 = vsmask.f32 (!%p161_p10), 3328  ;;  %vm298_vm1 = vsmask.f32 (!%p161_p10), 7440  ;;  %s2427_s4 = smov (!%p161_p10), 16  }
   0xf   : > { %164 = sbr.rel (%p161_p10) target bundleno = 550 (0x226), region = 32  ;;  %s2428_s5 = smov (!%p161_p10), 4   ;;  %vm2551_vm2 = vmor (!%p161_p10), %vm297_vm0, %vm298_vm1  ;;  %vm230_vm3 = vcmask (!%p161_p10), 31744   ;;  %vm276_vm4 = vcmask (!%p161_p10), 64544   ;;  %vm436_vm5 = vcmask (!%p161_p10), 97344   ;;  %vm593_vm6 = vcmask (!%p161_p10), 130144  }
  0x10   : > { %s2429_s6 = smov (!%p161_p10), 32   ;;  %s2430_s7 = smov (!%p161_p10), 20   ;;  %vm639_vm7 = vcmask (!%p161_p10), 162944   ;;  %vm685_vm8 = vcmask (!%p161_p10), 195744   ;;  %vm842_vm9 = vcmask (!%p161_p10), 228544   ;;  %vm999_vm10 = vcmask (!%p161_p10), 261344  }
  0x11   : > { %s2431_s8 = smov (!%p161_p10), 36   ;;  %s2432_s9 = smov (!%p161_p10), 12   ;;  %vm1045_vm11 = vcmask (!%p161_p10), 294144   ;;  %vm1091_vm12 = vcmask (!%p161_p10), 326944   ;;  %vm1248_vm13 = vcmask (!%p161_p10), 359744   ;;  %vm1405_vm14 = vcmask (!%p161_p10), 392544  }
  0x12   : > { %s2433_s10 = smov (!%p161_p10), 8   ;;  %s2434_s11 = smov (!%p161_p10), 24   ;;  %vm2443_vm15 = vmmov (!%p161_p10), 0   ;;  %vm1451_vm0 = vcmask (!%p161_p10), 425344   ;;  %vm1497_vm1 = vcmask (!%p161_p10), 458144  }
  0x13   : > { %s2435_s18 = smov (!%p161_p10), 28   ;;  %s2436_s19 = smov (!%p161_p10), 40  }
  0x14   : > { %s2437_s21 = smov (!%p161_p10), 44   ;;  %s2438_s23 = smov (!%p161_p10), 48  }
  0x15   : > { %s2441_s28 = smov (!%p161_p10), 60  }
  0x16   : > { %s189_s26 = scalar_select %p188_p11, %s2417_s15, 1 }
  0x18   : > { %s2240_s27 = smul.u32 288, %s189_s26  ;;  %s2439_s26 = smov 52  }
  0x1a   : > { %s2526_s30 = scalar_lea.vmem %s3039_s0, %s2240_s27  ;;  %s2440_s27 = smov 56  }
  0x1b   : > { %v2315_v0 = vld [vmem:[%s2526_s30 + $0x90] ss:$8 sps:$4 sm:$0xff]   ;;  %v2006_v6 = vld [vmem:[%s2526_s30 + $0x48] sm:$0xf]  ;;  %v2007_v7 = vld [vmem:[%s2526_s30 + $0x4c] sm:$0x1] }
  0x1c   : > { %v2316_v1 = vld [vmem:[%s2526_s30 + $0x48] ss:$8 sps:$4 sm:$0xff]   ;;  %627 = vrot.lane.b32.xlu1 %v2315_v0, %s2427_s4  ;;  %v2318_v3 = vld [vmem:[%s2526_s30 + $0xd8] ss:$8 sps:$4 sm:$0xff]   ;;  %v2009_v9 = vld [vmem:[%s2526_s30 + $0x54] sm:$0x1] }
  0x1d   : > { %v2317_v2 = vld [vmem:[%s2526_s30 + $0x8] ss:$8 sps:$4 sm:$0xff]   ;;  %264 = vrot.lane.b32.xlu0 %v2316_v1, %s2428_s5  ;;  %v2320_v5 = vld [vmem:[%s2526_s30 + $0x58] ss:$8 sps:$4 sm:$0xff]   ;;  %v458_v10 = vshrl.u32 %v2006_v6, 16  ;;  %v461_v11 = vshll.u32 %v2006_v6, 16 }
  0x1e   : > { %v2319_v4 = vld [vmem:[%s2526_s30 + $0x50] ss:$8 sps:$4 sm:$0xff]   ;;  %v467_v12 = vshll.u32 %v2007_v7, 16  ;;  %v481_v15 = vshll.u32 %v2009_v9, 16  ;;  %v281_v16 = vld [vmem:[%s2526_s30] sm:$0xf] }
  0x1f   : > { %v2008_v8 = vld [vmem:[%s2526_s30 + $0x50] sm:$0xf]  ;;  %v282_v17 = vld [vmem:[%s2526_s30 + $0x4] sm:$0x1]  ;;  %v460_v18 = vrot.slane %v458_v10, 4  ;;  %v463_v19 = vrot.slane %v461_v11, 5 }
  0x20   : > { %1033 = vrot.lane.b32.xlu1 %v2317_v2, %s2429_s6  ;;  %v472_v13 = vshrl.u32 %v2008_v8, 16  ;;  %v475_v14 = vshll.u32 %v2008_v8, 16  ;;  %v469_v20 = vrot.slane %v467_v12, 5  ;;  %v283_v22 = vld [vmem:[%s2526_s30 + $0x8] sm:$0xf]  ;;  %v483_v24 = vrot.slane %v481_v15, 5 }
  0x21   : > { %673 = vrot.lane.b32.xlu0 %v2318_v3, %s2430_s7  ;;  %v284_v25 = vld [vmem:[%s2526_s30 + $0xc] sm:$0x1]  ;;  %v301_v26 = vshrl.u32 %v281_v16, 16  ;;  %v304_v27 = vshll.u32 %v281_v16, 16  ;;  %v464_v28 = vor.u32 %v463_v19, %v460_v18  ;;  %v310_v29 = vshll.u32 %v282_v17, 16 }
  0x22   : > { %v474_v21 = vrot.slane %v472_v13, 4  ;;  %v477_v23 = vrot.slane %v475_v14, 5  ;;  %v315_v30 = vshrl.u32 %v283_v22, 16  ;;  %v318_v31 = vshll.u32 %v283_v22, 16  ;;  %v2050_v32 = vld [vmem:[%s2526_s30 + $0x90] sm:$0xf] }
  0x23   : > { %v303_v35 = vrot.slane %v301_v26, 4  ;;  %v306_v36 = vrot.slane %v304_v27, 5  ;;  %v324_v37 = vshll.u32 %v284_v25, 16  ;;  %v2051_v38 = vld [vmem:[%s2526_s30 + $0x94] sm:$0x1]  ;;  %v465_v39 = vrot.slane %v464_v28, 4 }
  0x24   : > { %1079 = vrot.lane.b32.xlu1 %v2319_v4, %s2431_s8  ;;  %v478_v34 = vor.u32 %v477_v23, %v474_v21  ;;  %v312_v40 = vrot.slane %v310_v29, 5  ;;  %v317_v41 = vrot.slane %v315_v30, 4  ;;  %v320_v42 = vrot.slane %v318_v31, 5  ;;  %v2052_v43 = vld [vmem:[%s2526_s30 + $0x98] sm:$0xf] }
  0x25   : > { %266 = vrot.lane.b32.xlu0 %v2320_v5, %s2428_s5  ;;  %v307_v45 = vor.u32 %v306_v36, %v303_v35  ;;  %v326_v46 = vrot.slane %v324_v37, 5  ;;  %v707_v47 = vshrl.u32 %v2050_v32, 16  ;;  %v470_v48 = vsel %vm2551_vm2, %v465_v39, %v469_v20  ;;  %v2053_v50 = vld [vmem:[%s2526_s30 + $0x9c] sm:$0x1]  ;;  %v2070_v57 = vld [vmem:[%s2526_s30 + $0xd8] sm:$0xf] }
  0x26   : > { %v479_v44 = vrot.slane %v478_v34, 4  ;;  %v321_v49 = vor.u32 %v320_v42, %v317_v41  ;;  %v710_v51 = vshll.u32 %v2050_v32, 16  ;;  %v716_v52 = vshll.u32 %v2051_v38, 16  ;;  %v2071_v62 = vld [vmem:[%s2526_s30 + $0xdc] sm:$0x1] }
  0x27   : > { %v308_v54 = vrot.slane %v307_v45, 4  ;;  %v709_v55 = vrot.slane %v707_v47, 4  ;;  %v721_v56 = vshrl.u32 %v2052_v43, 16  ;;  %v724_v1 = vshll.u32 %v2052_v43, 16  ;;  %v2072_v3 = vld [vmem:[%s2526_s30 + $0xe0] sm:$0xf] }
  0x28   : > { %v484_v53 = vsel %vm2551_vm2, %v479_v44, %v483_v24  ;;  %v322_v59 = vrot.slane %v321_v49, 4  ;;  %v712_v60 = vrot.slane %v710_v51, 5  ;;  %v718_v61 = vrot.slane %v716_v52, 5  ;;  %v2073_v6 = vld [vmem:[%s2526_s30 + $0xe4] sm:$0x1] }
  0x29   : > { %v2022_v58 = vcombine.low %v470_v48, %v484_v53  ;;  %v313_v63 = vsel %vm2551_vm2, %v308_v54, %v312_v40  ;;  %v723_v0 = vrot.slane %v721_v56, 4  ;;  %v730_v2 = vshll.u32 %v2053_v50, 16  ;;  %v285_v13 = vld [vmem:[%s2526_s30 + $0x10] sm:$0xf]  ;;  %v286_v18 = vld [vmem:[%s2526_s30 + $0x14] sm:$0x1] }
  0x2a   : > { %v327_v4 = vsel %vm2551_vm2, %v322_v59, %v326_v46  ;;  %v713_v5 = vor.u32 %v712_v60, %v709_v55  ;;  %v864_v7 = vshrl.u32 %v2070_v57, 16  ;;  %v867_v8 = vshll.u32 %v2070_v57, 16  ;;  %v287_v23 = vld [vmem:[%s2526_s30 + $0x18] sm:$0xf]  ;;  %v288_v31 = vld [vmem:[%s2526_s30 + $0x1c] sm:$0x1] }
  0x2b   : > { %581 = vrot.lane.b32.xlu1 %v2022_v58, %s2432_s9  ;;  %v2002_v9 = vcombine.low %v313_v63, %v327_v4  ;;  %v726_v10 = vrot.slane %v724_v1, 5  ;;  %v732_v11 = vrot.slane %v730_v2, 5  ;;  %v873_v12 = vshll.u32 %v2071_v62, 16  ;;  %v2114_v38 = vld [vmem:[%s2526_s30 + $0x8] sm:$0xf] }
  0x2c   : > { %v714_v14 = vrot.slane %v713_v5, 4  ;;  %v866_v15 = vrot.slane %v864_v7, 4  ;;  %v869_v16 = vrot.slane %v867_v8, 5  ;;  %v878_v17 = vshrl.u32 %v2072_v3, 16  ;;  %v2115_v43 = vld [vmem:[%s2526_s30 + $0xc] sm:$0x1] }
  0x2d   : > { %424 = vrot.lane.b32.xlu0 %v2002_v9, %s2433_s10  ;;  %v727_v19 = vor.u32 %v726_v10, %v723_v0  ;;  %v875_v20 = vrot.slane %v873_v12, 5  ;;  %v881_v21 = vshll.u32 %v2072_v3, 16  ;;  %v887_v22 = vshll.u32 %v2073_v6, 16  ;;  %v2116_v44 = vld [vmem:[%s2526_s30 + $0x10] sm:$0xf] }
  0x2e   : > { %v719_v24 = vsel %vm2551_vm2, %v714_v14, %v718_v61  ;;  %v870_v25 = vor.u32 %v869_v16, %v866_v15  ;;  %v880_v26 = vrot.slane %v878_v17, 4  ;;  %v329_v27 = vshrl.u32 %v285_v13, 16  ;;  %v2117_v53 = vld [vmem:[%s2526_s30 + $0x14] sm:$0x1]  ;;  %v2010_v54 = vld [vmem:[%s2526_s30 + $0x58] sm:$0xf] }
  0x2f   : > { %v728_v28 = vrot.slane %v727_v19, 4  ;;  %v883_v29 = vrot.slane %v881_v21, 5  ;;  %v889_v30 = vrot.slane %v887_v22, 5  ;;  %v332_v32 = vshll.u32 %v285_v13, 16  ;;  %v2011_v59 = vld [vmem:[%s2526_s30 + $0x5c] sm:$0x1] }
  0x30   : > { %v871_v34 = vrot.slane %v870_v25, 4  ;;  %v331_v35 = vrot.slane %v329_v27, 4  ;;  %v338_v36 = vshll.u32 %v286_v18, 16  ;;  %v343_v37 = vshrl.u32 %v287_v23, 16  ;;  %v2012_v4 = vld [vmem:[%s2526_s30 + $0x60] sm:$0xf] }
  0x31   : > { %v733_v39 = vsel %vm2551_vm2, %v728_v28, %v732_v11  ;;  %v884_v40 = vor.u32 %v883_v29, %v880_v26  ;;  %v334_v41 = vrot.slane %v332_v32, 5  ;;  %v346_v42 = vshll.u32 %v287_v23, 16  ;;  %v2013_v9 = vld [vmem:[%s2526_s30 + $0x64] sm:$0x1]  ;;  %v2134_v10 = vld [vmem:[%s2526_s30 + $0x50] sm:$0xf] }
  0x32   : > { %v2066_v45 = vcombine.low %v719_v24, %v733_v39  ;;  %v876_v46 = vsel %vm2551_vm2, %v871_v34, %v875_v20  ;;  %v340_v47 = vrot.slane %v338_v36, 5  ;;  %v345_v48 = vrot.slane %v343_v37, 4  ;;  %v2135_v15 = vld [vmem:[%s2526_s30 + $0x54] sm:$0x1]  ;;  %v2136_v20 = vld [vmem:[%s2526_s30 + $0x58] sm:$0xf] }
  0x33   : > { %v885_v49 = vrot.slane %v884_v40, 4  ;;  %v335_v50 = vor.u32 %v334_v41, %v331_v35  ;;  %v348_v51 = vrot.slane %v346_v42, 5  ;;  %v352_v52 = vshll.u32 %v288_v31, 16  ;;  %v2137_v32 = vld [vmem:[%s2526_s30 + $0x5c] sm:$0x1] }
  0x34   : > { %830 = vrot.lane.b32.xlu1 %v2066_v45, %s2434_s11  ;;  %v1113_v55 = vshrl.u32 %v2114_v38, 16  ;;  %v1116_v56 = vshll.u32 %v2114_v38, 16  ;;  %v1122_v57 = vshll.u32 %v2115_v43, 16  ;;  %v1127_v58 = vshrl.u32 %v2116_v44, 16 }
  0x35   : > { %v890_v60 = vsel %vm2551_vm2, %v885_v49, %v889_v30  ;;  %v336_v61 = vrot.slane %v335_v50, 4  ;;  %v349_v62 = vor.u32 %v348_v51, %v345_v48  ;;  %v354_v63 = vrot.slane %v352_v52, 5  ;;  %v2054_v51 = vld [vmem:[%s2526_s30 + $0xa0] sm:$0xf]  ;;  %v2055_v52 = vld [vmem:[%s2526_s30 + $0xa4] sm:$0x1] }
  0x36   : > { %v2086_v0 = vcombine.low %v876_v46, %v890_v60  ;;  %v1115_v1 = vrot.slane %v1113_v55, 4  ;;  %v1118_v2 = vrot.slane %v1116_v56, 5  ;;  %v1124_v3 = vrot.slane %v1122_v57, 5  ;;  %v2056_v56 = vld [vmem:[%s2526_s30 + $0xa8] sm:$0xf] }
  0x37   : > { %v341_v5 = vsel %vm2551_vm2, %v336_v61, %v340_v47  ;;  %v350_v6 = vrot.slane %v349_v62, 4  ;;  %v1129_v7 = vrot.slane %v1127_v58, 4  ;;  %v1130_v8 = vshll.u32 %v2116_v44, 16  ;;  %v2057_v60 = vld [vmem:[%s2526_s30 + $0xac] sm:$0x1] }
  0x38   : > { %987 = vrot.lane.b32.xlu0 %v2086_v0, %s2435_s18  ;;  %v1119_v11 = vor.u32 %v1118_v2, %v1115_v1  ;;  %v1136_v12 = vshll.u32 %v2117_v53, 16  ;;  %v486_v13 = vshrl.u32 %v2010_v54, 16  ;;  %v489_v14 = vshll.u32 %v2010_v54, 16 }
  0x39   : > { %v355_v16 = vsel %vm2551_vm2, %v350_v6, %v354_v63  ;;  %v1132_v17 = vrot.slane %v1130_v8, 5  ;;  %v495_v18 = vshll.u32 %v2011_v59, 16  ;;  %v500_v19 = vshrl.u32 %v2012_v4, 16  ;;  %v2179_v8 = vld [vmem:[%s2526_s30 + $0x9c] sm:$0x1] }
  0x3a   : > { %v2003_v21 = vcombine.low %v341_v5, %v355_v16  ;;  %v1120_v22 = vrot.slane %v1119_v11, 4  ;;  %v1138_v23 = vrot.slane %v1136_v12, 5  ;;  %v488_v24 = vrot.slane %v486_v13, 4 }
  0x3b   : > { %v1133_v25 = vor.u32 %v1132_v17, %v1129_v7  ;;  %v491_v26 = vrot.slane %v489_v14, 5  ;;  %v497_v27 = vrot.slane %v495_v18, 5  ;;  %v502_v28 = vrot.slane %v500_v19, 4 }
  0x3c   : > { %426 = vrot.lane.b32.xlu0 %v2003_v21, %s2433_s10  ;;  %v1125_v29 = vsel %vm2551_vm2, %v1120_v22, %v1124_v3  ;;  %v503_v30 = vshll.u32 %v2012_v4, 16  ;;  %v509_v31 = vshll.u32 %v2013_v9, 16  ;;  %v1270_v34 = vshrl.u32 %v2134_v10, 16  ;;  %v2178_v3 = vld [vmem:[%s2526_s30 + $0x98] sm:$0xf] }
  0x3d   : > { %v1134_v35 = vrot.slane %v1133_v25, 4  ;;  %v492_v36 = vor.u32 %v491_v26, %v488_v24  ;;  %v1273_v37 = vshll.u32 %v2134_v10, 16  ;;  %v1279_v38 = vshll.u32 %v2135_v15, 16  ;;  %v2180_v9 = vld [vmem:[%s2526_s30 + $0xa0] sm:$0xf] }
  0x3e   : > { %v505_v39 = vrot.slane %v503_v30, 5  ;;  %v511_v40 = vrot.slane %v509_v31, 5  ;;  %v1272_v41 = vrot.slane %v1270_v34, 4  ;;  %v1284_v42 = vshrl.u32 %v2136_v20, 16  ;;  %v2321_v15 = vld [vmem:[%s2526_s30 + $0xa0] ss:$8 sps:$4 sm:$0xff]  }
  0x3f   : > { %v1139_v43 = vsel %vm2551_vm2, %v1134_v35, %v1138_v23  ;;  %v493_v44 = vrot.slane %v492_v36, 4  ;;  %v1275_v45 = vrot.slane %v1273_v37, 5  ;;  %v1281_v46 = vrot.slane %v1279_v38, 5  ;;  %v2322_v30 = vld [vmem:[%s2526_s30 + $0x98] ss:$8 sps:$4 sm:$0xff]  }
  0x40   : > { %v2130_v47 = vcombine.low %v1125_v29, %v1139_v43  ;;  %v506_v48 = vor.u32 %v505_v39, %v502_v28  ;;  %v1286_v49 = vrot.slane %v1284_v42, 4  ;;  %v1287_v50 = vshll.u32 %v2136_v20, 16  ;;  %v2181_v20 = vld [vmem:[%s2526_s30 + $0xa4] sm:$0x1]  ;;  %v2074_v28 = vld [vmem:[%s2526_s30 + $0xe8] sm:$0xf] }
  0x41   : > { %v498_v53 = vsel %vm2551_vm2, %v493_v44, %v497_v27  ;;  %v1276_v54 = vor.u32 %v1275_v45, %v1272_v41  ;;  %v1293_v55 = vshll.u32 %v2137_v32, 16  ;;  %v735_v57 = vshrl.u32 %v2054_v51, 16  ;;  %v2323_v31 = vld [vmem:[%s2526_s30 + $0xe8] ss:$8 sps:$4 sm:$0xff]   ;;  %v2075_v36 = vld [vmem:[%s2526_s30 + $0xec] sm:$0x1] }
  0x42   : > { %1236 = vrot.lane.b32.xlu1 %v2130_v47, %s2436_s19  ;;  %v507_v58 = vrot.slane %v506_v48, 4  ;;  %v1289_v59 = vrot.slane %v1287_v50, 5  ;;  %v738_v61 = vshll.u32 %v2054_v51, 16  ;;  %v744_v62 = vshll.u32 %v2055_v52, 16  ;;  %v2076_v37 = vld [vmem:[%s2526_s30 + $0xf0] sm:$0xf] }
  0x43   : > { %v1277_v63 = vrot.slane %v1276_v54, 4  ;;  %v1295_v0 = vrot.slane %v1293_v55, 5  ;;  %v737_v1 = vrot.slane %v735_v57, 4  ;;  %v749_v2 = vshrl.u32 %v2056_v56, 16  ;;  %v2077_v42 = vld [vmem:[%s2526_s30 + $0xf4] sm:$0x1] }
  0x44   : > { %v512_v4 = vsel %vm2551_vm2, %v507_v58, %v511_v40  ;;  %v1290_v5 = vor.u32 %v1289_v59, %v1286_v49  ;;  %v740_v6 = vrot.slane %v738_v61, 5  ;;  %v746_v7 = vrot.slane %v744_v62, 5  ;;  %v2198_v47 = vld [vmem:[%s2526_s30 + $0xe0] sm:$0xf]  ;;  %v2199_v48 = vld [vmem:[%s2526_s30 + $0xe4] sm:$0x1] }
  0x45   : > { %v2023_v10 = vcombine.low %v498_v53, %v512_v4  ;;  %v1282_v11 = vsel %vm2551_vm2, %v1277_v63, %v1281_v46  ;;  %v751_v12 = vrot.slane %v749_v2, 4  ;;  %v752_v13 = vshll.u32 %v2056_v56, 16  ;;  %v2200_v57 = vld [vmem:[%s2526_s30 + $0xe8] sm:$0xf] }
  0x46   : > { %v1291_v14 = vrot.slane %v1290_v5, 4  ;;  %v741_v16 = vor.u32 %v740_v6, %v737_v1  ;;  %v758_v17 = vshll.u32 %v2057_v60, 16  ;;  %v1519_v18 = vshrl.u32 %v2178_v3, 16  ;;  %v2324_v62 = vld [vmem:[%s2526_s30 + $0xe0] ss:$8 sps:$4 sm:$0xff]  }
  0x47   : > { %583 = vrot.lane.b32.xlu0 %v2023_v10, %s2432_s9  ;;  %v754_v19 = vrot.slane %v752_v13, 5  ;;  %v1522_v21 = vshll.u32 %v2178_v3, 16  ;;  %v1528_v22 = vshll.u32 %v2179_v8, 16  ;;  %v1533_v23 = vshrl.u32 %v2180_v9, 16  ;;  %v2201_v10 = vld [vmem:[%s2526_s30 + $0xec] sm:$0x1] }
  0x48   : > { %v1296_v24 = vsel %vm2551_vm2, %v1291_v14, %v1295_v0  ;;  %v742_v25 = vrot.slane %v741_v16, 4  ;;  %v760_v26 = vrot.slane %v758_v17, 5  ;;  %v1521_v27 = vrot.slane %v1519_v18, 4  ;;  %v289_v16 = vld [vmem:[%s2526_s30 + $0x20] sm:$0xf] }
  0x49   : > { %v2150_v29 = vcombine.low %v1282_v11, %v1296_v24  ;;  %v755_v32 = vor.u32 %v754_v19, %v751_v12  ;;  %v1524_v34 = vrot.slane %v1522_v21, 5  ;;  %v1530_v35 = vrot.slane %v1528_v22, 5  ;;  %v290_v21 = vld [vmem:[%s2526_s30 + $0x24] sm:$0x1]  ;;  %v291_v22 = vld [vmem:[%s2526_s30 + $0x28] sm:$0xf] }
  0x4a   : > { %v747_v38 = vsel %vm2551_vm2, %v742_v25, %v746_v7  ;;  %v1535_v39 = vrot.slane %v1533_v23, 4  ;;  %v1536_v40 = vshll.u32 %v2180_v9, 16  ;;  %v1542_v41 = vshll.u32 %v2181_v20, 16 }
  0x4b   : > { %1393 = vrot.lane.b32.xlu1 %v2150_v29, %s2437_s21  ;;  %629 = vrot.lane.b32.xlu0 %v2321_v15, %s2427_s4  ;;  %v756_v43 = vrot.slane %v755_v32, 4  ;;  %v1525_v44 = vor.u32 %v1524_v34, %v1521_v27  ;;  %v892_v45 = vshrl.u32 %v2074_v28, 16  ;;  %v895_v46 = vshll.u32 %v2074_v28, 16  ;;  %v2118_v32 = vld [vmem:[%s2526_s30 + $0x18] sm:$0xf] }
  0x4c   : > { %v1538_v49 = vrot.slane %v1536_v40, 5  ;;  %v1544_v50 = vrot.slane %v1542_v41, 5  ;;  %v901_v51 = vshll.u32 %v2075_v36, 16  ;;  %v906_v52 = vshrl.u32 %v2076_v37, 16 }
  0x4d   : > { %v761_v53 = vsel %vm2551_vm2, %v756_v43, %v760_v26  ;;  %v1526_v54 = vrot.slane %v1525_v44, 4  ;;  %v894_v55 = vrot.slane %v892_v45, 4  ;;  %v897_v56 = vrot.slane %v895_v46, 5  ;;  %v292_v26 = vld [vmem:[%s2526_s30 + $0x2c] sm:$0x1] }
  0x4e   : > { %v2067_v58 = vcombine.low %v747_v38, %v761_v53  ;;  %v1539_v59 = vor.u32 %v1538_v49, %v1535_v39  ;;  %v903_v60 = vrot.slane %v901_v51, 5  ;;  %v908_v61 = vrot.slane %v906_v52, 4  ;;  %v2119_v38 = vld [vmem:[%s2526_s30 + $0x1c] sm:$0x1]  ;;  %v2120_v43 = vld [vmem:[%s2526_s30 + $0x20] sm:$0xf] }
  0x4f   : > { %1439 = vrot.lane.b32.xlu1 %v2322_v30, %s2438_s23  ;;  %675 = vrot.lane.b32.xlu0 %v2323_v31, %s2430_s7  ;;  %v1531_v63 = vsel %vm2551_vm2, %v1526_v54, %v1530_v35  ;;  %v898_v0 = vor.u32 %v897_v56, %v894_v55  ;;  %v909_v1 = vshll.u32 %v2076_v37, 16  ;;  %v915_v2 = vshll.u32 %v2077_v42, 16  ;;  %v2121_v55 = vld [vmem:[%s2526_s30 + $0x24] sm:$0x1] }
  0x50   : > { %v1540_v3 = vrot.slane %v1539_v59, 4  ;;  %v1676_v4 = vshrl.u32 %v2198_v47, 16  ;;  %v1679_v5 = vshll.u32 %v2198_v47, 16  ;;  %v1685_v6 = vshll.u32 %v2199_v48, 16  ;;  %v2325_v48 = vld [vmem:[%s2526_s30 + $0x18] ss:$8 sps:$4 sm:$0xff]  }
  0x51   : > { %v899_v7 = vrot.slane %v898_v0, 4  ;;  %v911_v8 = vrot.slane %v909_v1, 5  ;;  %v917_v9 = vrot.slane %v915_v2, 5  ;;  %v1690_v11 = vshrl.u32 %v2200_v57, 16  ;;  %v2327_v0 = vld [vmem:[%s2526_s30 + $0x60] ss:$8 sps:$4 sm:$0xff]  }
  0x52   : > { %v1545_v12 = vsel %vm2551_vm2, %v1540_v3, %v1544_v50  ;;  %v1678_v13 = vrot.slane %v1676_v4, 4  ;;  %v1681_v14 = vrot.slane %v1679_v5, 5  ;;  %v1687_v15 = vrot.slane %v1685_v6, 5  ;;  %v2016_v4 = vld [vmem:[%s2526_s30 + $0x70] sm:$0xf] }
  0x53   : > { %1485 = vrot.lane.b32.xlu1 %v2324_v62, %s2439_s26  ;;  %832 = vrot.lane.b32.xlu0 %v2067_v58, %s2434_s11  ;;  %v2194_v17 = vcombine.low %v1531_v63, %v1545_v12  ;;  %v904_v18 = vsel %vm2551_vm2, %v899_v7, %v903_v60  ;;  %v912_v19 = vor.u32 %v911_v8, %v908_v61  ;;  %v1692_v20 = vrot.slane %v1690_v11, 4  ;;  %v2014_v62 = vld [vmem:[%s2526_s30 + $0x68] sm:$0xf]  ;;  %v2017_v11 = vld [vmem:[%s2526_s30 + $0x74] sm:$0x1] }
  0x54   : > { %v1682_v23 = vor.u32 %v1681_v14, %v1678_v13  ;;  %v1693_v24 = vshll.u32 %v2200_v57, 16  ;;  %v1699_v25 = vshll.u32 %v2201_v10, 16  ;;  %v357_v27 = vshrl.u32 %v289_v16, 16  ;;  %v2326_v6 = vld [vmem:[%s2526_s30 + $0x68] ss:$8 sps:$4 sm:$0xff]  }
  0x55   : > { %v913_v28 = vrot.slane %v912_v19, 4  ;;  %v360_v29 = vshll.u32 %v289_v16, 16  ;;  %v366_v30 = vshll.u32 %v290_v21, 16  ;;  %v371_v31 = vshrl.u32 %v291_v22, 16  ;;  %v2015_v10 = vld [vmem:[%s2526_s30 + $0x6c] sm:$0x1] }
  0x56   : > { %v1683_v34 = vrot.slane %v1682_v23, 4  ;;  %v1695_v35 = vrot.slane %v1693_v24, 5  ;;  %v1701_v36 = vrot.slane %v1699_v25, 5  ;;  %v359_v37 = vrot.slane %v357_v27, 4  ;;  %v2138_v16 = vld [vmem:[%s2526_s30 + $0x60] sm:$0xf] }
  0x57   : > { %1642 = vrot.lane.b32.xlu1 %v2194_v17, %s2440_s27  ;;  %v918_v39 = vsel %vm2551_vm2, %v913_v28, %v917_v9  ;;  %v362_v40 = vrot.slane %v360_v29, 5  ;;  %v368_v41 = vrot.slane %v366_v30, 5  ;;  %v373_v42 = vrot.slane %v371_v31, 4  ;;  %v2139_v17 = vld [vmem:[%s2526_s30 + $0x64] sm:$0x1] }
  0x58   : > { %v2087_v44 = vcombine.low %v904_v18, %v918_v39  ;;  %v1688_v45 = vsel %vm2551_vm2, %v1683_v34, %v1687_v15  ;;  %v1696_v46 = vor.u32 %v1695_v35, %v1692_v20  ;;  %v374_v47 = vshll.u32 %v291_v22, 16  ;;  %v2140_v25 = vld [vmem:[%s2526_s30 + $0x68] sm:$0xf]  ;;  %v2141_v35 = vld [vmem:[%s2526_s30 + $0x6c] sm:$0x1] }
  0x59   : > { %v363_v49 = vor.u32 %v362_v40, %v359_v37  ;;  %v380_v50 = vshll.u32 %v292_v26, 16  ;;  %v1141_v51 = vshrl.u32 %v2118_v32, 16  ;;  %v1144_v52 = vshll.u32 %v2118_v32, 16 }
  0x5a   : > { %989 = vrot.lane.b32.xlu0 %v2087_v44, %s2435_s18  ;;  %v1697_v53 = vrot.slane %v1696_v46, 4  ;;  %v376_v54 = vrot.slane %v374_v47, 5  ;;  %v1150_v56 = vshll.u32 %v2119_v38, 16  ;;  %v1155_v57 = vshrl.u32 %v2120_v43, 16 }
  0x5b   : > { %v364_v58 = vrot.slane %v363_v49, 4  ;;  %v382_v59 = vrot.slane %v380_v50, 5  ;;  %v1143_v60 = vrot.slane %v1141_v51, 4  ;;  %v1146_v61 = vrot.slane %v1144_v52, 5 }
  0x5c   : > { %v1702_v63 = vsel %vm2551_vm2, %v1697_v53, %v1701_v36  ;;  %v377_v1 = vor.u32 %v376_v54, %v373_v42  ;;  %v1152_v2 = vrot.slane %v1150_v56, 5  ;;  %v1157_v3 = vrot.slane %v1155_v57, 4 }
  0x5d   : > { %v2214_v5 = vcombine.low %v1688_v45, %v1702_v63  ;;  %v369_v7 = vsel %vm2551_vm2, %v364_v58, %v368_v41  ;;  %v1147_v8 = vor.u32 %v1146_v61, %v1143_v60  ;;  %v1158_v9 = vshll.u32 %v2120_v43, 16  ;;  %v2059_v58 = vld [vmem:[%s2526_s30 + $0xb4] sm:$0x1] }
  0x5e   : > { %1035 = vrot.lane.b32.xlu0 %v2325_v48, %s2429_s6  ;;  %v378_v12 = vrot.slane %v377_v1, 4  ;;  %v1164_v13 = vshll.u32 %v2121_v55, 16  ;;  %v514_v14 = vshrl.u32 %v2014_v62, 16  ;;  %v517_v15 = vshll.u32 %v2014_v62, 16  ;;  %v2058_v55 = vld [vmem:[%s2526_s30 + $0xb0] sm:$0xf] }
  0x5f   : > { %1799 = vrot.lane.b32.xlu1 %v2214_v5, %s2441_s28  ;;  %v1148_v18 = vrot.slane %v1147_v8, 4  ;;  %v1160_v19 = vrot.slane %v1158_v9, 5  ;;  %v528_v20 = vshrl.u32 %v2016_v4, 16  ;;  %v523_v24 = vshll.u32 %v2015_v10, 16 }
  0x60   : > { %v383_v21 = vsel %vm2551_vm2, %v378_v12, %v382_v59  ;;  %v516_v22 = vrot.slane %v514_v14, 4  ;;  %v519_v23 = vrot.slane %v517_v15, 5  ;;  %v1166_v29 = vrot.slane %v1164_v13, 5  ;;  %v2060_v59 = vld [vmem:[%s2526_s30 + $0xb8] sm:$0xf] }
  0x61   : > { %v2004_v26 = vcombine.low %v369_v7, %v383_v21  ;;  %v1153_v27 = vsel %vm2551_vm2, %v1148_v18, %v1152_v2  ;;  %v1161_v28 = vor.u32 %v1160_v19, %v1157_v3  ;;  %v530_v31 = vrot.slane %v528_v20, 4  ;;  %v2184_v12 = vld [vmem:[%s2526_s30 + $0xb0] sm:$0xf]  ;;  %v2185_v20 = vld [vmem:[%s2526_s30 + $0xb4] sm:$0x1] }
  0x62   : > { %1081 = vrot.lane.b32.xlu0 %v2327_v0, %s2431_s8  ;;  %v520_v30 = vor.u32 %v519_v23, %v516_v22  ;;  %v531_v32 = vshll.u32 %v2016_v4, 16  ;;  %v537_v34 = vshll.u32 %v2017_v11, 16  ;;  %v1298_v37 = vshrl.u32 %v2138_v16, 16  ;;  %v2061_v0 = vld [vmem:[%s2526_s30 + $0xbc] sm:$0x1] }
  0x63   : > { %268 = vrot.lane.b32.xlu1 %v2326_v6, %s2428_s5  ;;  %v1162_v36 = vrot.slane %v1161_v28, 4  ;;  %v1301_v38 = vshll.u32 %v2138_v16, 16  ;;  %v1307_v39 = vshll.u32 %v2139_v17, 16  ;;  %v525_v41 = vrot.slane %v523_v24, 5  ;;  %v2182_v6 = vld [vmem:[%s2526_s30 + $0xa8] sm:$0xf] }
  0x64   : > { %v521_v40 = vrot.slane %v520_v30, 4  ;;  %v533_v42 = vrot.slane %v531_v32, 5  ;;  %v1312_v43 = vshrl.u32 %v2140_v25, 16  ;;  %v1300_v45 = vrot.slane %v1298_v37, 4  ;;  %v2183_v11 = vld [vmem:[%s2526_s30 + $0xac] sm:$0x1] }
  0x65   : > { %v1167_v44 = vsel %vm2551_vm2, %v1162_v36, %v1166_v29  ;;  %v1303_v46 = vrot.slane %v1301_v38, 5  ;;  %v539_v49 = vrot.slane %v537_v34, 5  ;;  %v1309_v50 = vrot.slane %v1307_v39, 5  ;;  %v2328_v13 = vld [vmem:[%s2526_s30 + $0xb0] ss:$8 sps:$4 sm:$0xff]  }
  0x66   : > { %v2131_v47 = vcombine.low %v1153_v27, %v1167_v44  ;;  %v534_v48 = vor.u32 %v533_v42, %v530_v31  ;;  %v1314_v52 = vrot.slane %v1312_v43, 4  ;;  %v1315_v53 = vshll.u32 %v2140_v25, 16  ;;  %v2078_v27 = vld [vmem:[%s2526_s30 + $0xf8] sm:$0xf]  ;;  %v2079_v32 = vld [vmem:[%s2526_s30 + $0xfc] sm:$0x1] }
  0x67   : > { %428 = vrot.lane.b32.xlu1 %v2004_v26, %s2433_s10  ;;  %v1304_v51 = vor.u32 %v1303_v46, %v1300_v45  ;;  %v1321_v54 = vshll.u32 %v2141_v35, 16  ;;  %v526_v56 = vsel %vm2551_vm2, %v521_v40, %v525_v41  ;;  %v763_v60 = vshrl.u32 %v2058_v55, 16  ;;  %v2329_v35 = vld [vmem:[%s2526_s30 + $0xa8] ss:$8 sps:$4 sm:$0xff]   ;;  %v2330_v36 = vld [vmem:[%s2526_s30 + $0xf8] ss:$8 sps:$4 sm:$0xff]  }
  0x68   : > { %1238 = vrot.lane.b32.xlu0 %v2131_v47, %s2436_s19  ;;  %v535_v57 = vrot.slane %v534_v48, 4  ;;  %v1317_v62 = vrot.slane %v1315_v53, 5  ;;  %v766_v1 = vshll.u32 %v2058_v55, 16  ;;  %v772_v4 = vshll.u32 %v2059_v58, 16  ;;  %v2080_v40 = vld [vmem:[%s2526_s30 + $0x100] sm:$0xf] }
  0x69   : > { %v1305_v61 = vrot.slane %v1304_v51, 4  ;;  %v1323_v63 = vrot.slane %v1321_v54, 5  ;;  %v765_v3 = vrot.slane %v763_v60, 4  ;;  %v777_v5 = vshrl.u32 %v2060_v59, 16  ;;  %v2081_v45 = vld [vmem:[%s2526_s30 + $0x104] sm:$0x1] }
  0x6a   : > { %v540_v2 = vsel %vm2551_vm2, %v535_v57, %v539_v49  ;;  %v1318_v9 = vor.u32 %v1317_v62, %v1314_v52  ;;  %v768_v10 = vrot.slane %v766_v1, 5  ;;  %v774_v14 = vrot.slane %v772_v4, 5  ;;  %v2202_v46 = vld [vmem:[%s2526_s30 + $0xf0] sm:$0xf]  ;;  %v2203_v51 = vld [vmem:[%s2526_s30 + $0xf4] sm:$0x1] }
  0x6b   : > { %v2024_v7 = vcombine.low %v526_v56, %v540_v2  ;;  %v1310_v8 = vsel %vm2551_vm2, %v1305_v61, %v1309_v50  ;;  %v779_v15 = vrot.slane %v777_v5, 4  ;;  %v780_v16 = vshll.u32 %v2060_v59, 16  ;;  %v2204_v52 = vld [vmem:[%s2526_s30 + $0xf8] sm:$0xf] }
  0x6c   : > { %v786_v17 = vshll.u32 %v2061_v0, 16  ;;  %v1319_v18 = vrot.slane %v1318_v9, 4  ;;  %v769_v19 = vor.u32 %v768_v10, %v765_v3  ;;  %v1547_v21 = vshrl.u32 %v2182_v6, 16  ;;  %v2331_v61 = vld [vmem:[%s2526_s30 + $0xf0] ss:$8 sps:$4 sm:$0xff]  }
  0x6d   : > { %585 = vrot.lane.b32.xlu1 %v2024_v7, %s2432_s9  ;;  %v1550_v22 = vshll.u32 %v2182_v6, 16  ;;  %v782_v23 = vrot.slane %v780_v16, 5  ;;  %v1556_v25 = vshll.u32 %v2183_v11, 16  ;;  %v1561_v26 = vshrl.u32 %v2184_v12, 16  ;;  %v2205_v7 = vld [vmem:[%s2526_s30 + $0xfc] sm:$0x1] }
  0x6e   : > { %v788_v24 = vrot.slane %v786_v17, 5  ;;  %v1324_v28 = vsel %vm2551_vm2, %v1319_v18, %v1323_v63  ;;  %v770_v29 = vrot.slane %v769_v19, 4  ;;  %v1549_v30 = vrot.slane %v1547_v21, 4 }
  0x6f   : > { %v1552_v31 = vrot.slane %v1550_v22, 5  ;;  %v2151_v34 = vcombine.low %v1310_v8, %v1324_v28  ;;  %v783_v37 = vor.u32 %v782_v23, %v779_v15  ;;  %v1558_v38 = vrot.slane %v1556_v25, 5  ;;  %v293_v22 = vld [vmem:[%s2526_s30 + $0x30] sm:$0xf] }
  0x70   : > { %v1563_v39 = vrot.slane %v1561_v26, 4  ;;  %v775_v41 = vsel %vm2551_vm2, %v770_v29, %v774_v14  ;;  %v1564_v43 = vshll.u32 %v2184_v12, 16  ;;  %v1570_v44 = vshll.u32 %v2185_v20, 16  ;;  %v294_v26 = vld [vmem:[%s2526_s30 + $0x34] sm:$0x1] }
  0x71   : > { %631 = vrot.lane.b32.xlu1 %v2328_v13, %s2427_s4  ;;  %v1553_v42 = vor.u32 %v1552_v31, %v1549_v30  ;;  %1395 = vrot.lane.b32.xlu0 %v2151_v34, %s2437_s21  ;;  %v784_v47 = vrot.slane %v783_v37, 4  ;;  %v920_v48 = vshrl.u32 %v2078_v27, 16  ;;  %v923_v49 = vshll.u32 %v2078_v27, 16  ;;  %v295_v27 = vld [vmem:[%s2526_s30 + $0x38] sm:$0xf] }
  0x72   : > { %v929_v50 = vshll.u32 %v2079_v32, 16  ;;  %v1566_v54 = vrot.slane %v1564_v43, 5  ;;  %v1572_v55 = vrot.slane %v1570_v44, 5  ;;  %v934_v56 = vshrl.u32 %v2080_v40, 16  ;;  %v296_v31 = vld [vmem:[%s2526_s30 + $0x3c] sm:$0x1] }
  0x73   : > { %v1554_v53 = vrot.slane %v1553_v42, 4  ;;  %v789_v57 = vsel %vm2551_vm2, %v784_v47, %v788_v24  ;;  %v922_v58 = vrot.slane %v920_v48, 4  ;;  %v925_v59 = vrot.slane %v923_v49, 5  ;;  %v2123_v44 = vld [vmem:[%s2526_s30 + $0x2c] sm:$0x1] }
  0x74   : > { %v931_v60 = vrot.slane %v929_v50, 5  ;;  %v2068_v62 = vcombine.low %v775_v41, %v789_v57  ;;  %v1567_v0 = vor.u32 %v1566_v54, %v1563_v39  ;;  %v936_v1 = vrot.slane %v934_v56, 4  ;;  %v2122_v39 = vld [vmem:[%s2526_s30 + $0x28] sm:$0xf]  ;;  %v2125_v56 = vld [vmem:[%s2526_s30 + $0x34] sm:$0x1] }
  0x75   : > { %677 = vrot.lane.b32.xlu1 %v2330_v36, %s2430_s7  ;;  %v1559_v63 = vsel %vm2551_vm2, %v1554_v53, %v1558_v38  ;;  %1441 = vrot.lane.b32.xlu0 %v2329_v35, %s2438_s23  ;;  %v926_v2 = vor.u32 %v925_v59, %v922_v58  ;;  %v937_v3 = vshll.u32 %v2080_v40, 16  ;;  %v943_v4 = vshll.u32 %v2081_v45, 16  ;;  %v2124_v45 = vld [vmem:[%s2526_s30 + $0x30] sm:$0xf] }
  0x76   : > { %v1704_v5 = vshrl.u32 %v2202_v46, 16  ;;  %v1568_v6 = vrot.slane %v1567_v0, 4  ;;  %v1707_v8 = vshll.u32 %v2202_v46, 16  ;;  %v1713_v9 = vshll.u32 %v2203_v51, 16  ;;  %v2332_v51 = vld [vmem:[%s2526_s30 + $0x28] ss:$8 sps:$4 sm:$0xff]  }
  0x77   : > { %v1718_v10 = vshrl.u32 %v2204_v52, 16  ;;  %v927_v11 = vrot.slane %v926_v2, 4  ;;  %v939_v12 = vrot.slane %v937_v3, 5  ;;  %v945_v15 = vrot.slane %v943_v4, 5  ;;  %v2018_v0 = vld [vmem:[%s2526_s30 + $0x78] sm:$0xf] }
  0x78   : > { %v1706_v13 = vrot.slane %v1704_v5, 4  ;;  %v1573_v14 = vsel %vm2551_vm2, %v1568_v6, %v1572_v55  ;;  %v1709_v16 = vrot.slane %v1707_v8, 5  ;;  %v1715_v17 = vrot.slane %v1713_v9, 5  ;;  %v2333_v2 = vld [vmem:[%s2526_s30 + $0x78] ss:$8 sps:$4 sm:$0xff]  }
  0x79   : > { %834 = vrot.lane.b32.xlu1 %v2068_v62, %s2434_s11  ;;  %1487 = vrot.lane.b32.xlu0 %v2331_v61, %s2439_s26  ;;  %v2195_v18 = vcombine.low %v1559_v63, %v1573_v14  ;;  %v940_v19 = vor.u32 %v939_v12, %v936_v1  ;;  %v1720_v20 = vrot.slane %v1718_v10, 4  ;;  %v1721_v21 = vshll.u32 %v2204_v52, 16  ;;  %v2334_v3 = vld [vmem:[%s2526_s30 + $0x70] ss:$8 sps:$4 sm:$0xff]   ;;  %v2020_v8 = vld [vmem:[%s2526_s30 + $0x80] sm:$0xf] }
  0x7a   : > { %v932_v23 = vsel %vm2551_vm2, %v927_v11, %v931_v60  ;;  %v1710_v24 = vor.u32 %v1709_v16, %v1706_v13  ;;  %v1727_v25 = vshll.u32 %v2205_v7, 16  ;;  %v385_v28 = vshrl.u32 %v293_v22, 16  ;;  %v2019_v7 = vld [vmem:[%s2526_s30 + $0x7c] sm:$0x1]  ;;  %v2021_v13 = vld [vmem:[%s2526_s30 + $0x84] sm:$0x1] }
  0x7b   : > { %v941_v29 = vrot.slane %v940_v19, 4  ;;  %v1723_v30 = vrot.slane %v1721_v21, 5  ;;  %v388_v32 = vshll.u32 %v293_v22, 16  ;;  %v394_v34 = vshll.u32 %v294_v26, 16  ;;  %v2143_v19 = vld [vmem:[%s2526_s30 + $0x74] sm:$0x1] }
  0x7c   : > { %v1711_v35 = vrot.slane %v1710_v24, 4  ;;  %v1729_v36 = vrot.slane %v1727_v25, 5  ;;  %v387_v37 = vrot.slane %v385_v28, 4  ;;  %v399_v38 = vshrl.u32 %v295_v27, 16 }
  0x7d   : > { %1644 = vrot.lane.b32.xlu0 %v2195_v18, %s2440_s27  ;;  %v946_v40 = vsel %vm2551_vm2, %v941_v29, %v945_v15  ;;  %v1724_v41 = vor.u32 %v1723_v30, %v1720_v20  ;;  %v390_v42 = vrot.slane %v388_v32, 5  ;;  %v396_v43 = vrot.slane %v394_v34, 5  ;;  %v2142_v18 = vld [vmem:[%s2526_s30 + $0x70] sm:$0xf] }
  0x7e   : > { %v2088_v46 = vcombine.low %v932_v23, %v946_v40  ;;  %v1716_v47 = vsel %vm2551_vm2, %v1711_v35, %v1715_v17  ;;  %v401_v48 = vrot.slane %v399_v38, 4  ;;  %v402_v49 = vshll.u32 %v295_v27, 16 }
  0x7f   : > { %v1725_v50 = vrot.slane %v1724_v41, 4  ;;  %v391_v52 = vor.u32 %v390_v42, %v387_v37  ;;  %v408_v53 = vshll.u32 %v296_v31, 16  ;;  %v1169_v54 = vshrl.u32 %v2122_v39, 16  ;;  %v2144_v31 = vld [vmem:[%s2526_s30 + $0x78] sm:$0xf] }
  0x80   : > { %991 = vrot.lane.b32.xlu1 %v2088_v46, %s2435_s18  ;;  %v404_v55 = vrot.slane %v402_v49, 5  ;;  %v1172_v57 = vshll.u32 %v2122_v39, 16  ;;  %v1178_v58 = vshll.u32 %v2123_v44, 16  ;;  %v1183_v59 = vshrl.u32 %v2124_v45, 16  ;;  %v2145_v37 = vld [vmem:[%s2526_s30 + $0x7c] sm:$0x1] }
  0x81   : > { %v1730_v60 = vsel %vm2551_vm2, %v1725_v50, %v1729_v36  ;;  %v392_v61 = vrot.slane %v391_v52, 4  ;;  %v410_v62 = vrot.slane %v408_v53, 5  ;;  %v1171_v63 = vrot.slane %v1169_v54, 4 }
  0x82   : > { %v2215_v1 = vcombine.low %v1716_v47, %v1730_v60  ;;  %v405_v4 = vor.u32 %v404_v55, %v401_v48  ;;  %v1174_v5 = vrot.slane %v1172_v57, 5  ;;  %v1180_v6 = vrot.slane %v1178_v58, 5  ;;  %v2062_v57 = vld [vmem:[%s2526_s30 + $0xc0] sm:$0xf]  ;;  %v2063_v60 = vld [vmem:[%s2526_s30 + $0xc4] sm:$0x1] }
  0x83   : > { %v397_v9 = vsel %vm2551_vm2, %v392_v61, %v396_v43  ;;  %v1185_v10 = vrot.slane %v1183_v59, 4  ;;  %v1186_v11 = vshll.u32 %v2124_v45, 16  ;;  %v1192_v12 = vshll.u32 %v2125_v56, 16  ;;  %v2064_v61 = vld [vmem:[%s2526_s30 + $0xc8] sm:$0xf] }
  0x84   : > { %1801 = vrot.lane.b32.xlu0 %v2215_v1, %s2441_s28  ;;  %1037 = vrot.lane.b32.xlu1 %v2332_v51, %s2429_s6  ;;  %v406_v14 = vrot.slane %v405_v4, 4  ;;  %v1175_v15 = vor.u32 %v1174_v5, %v1171_v63  ;;  %v542_v16 = vshrl.u32 %v2018_v0, 16  ;;  %v545_v17 = vshll.u32 %v2018_v0, 16 }
  0x85   : > { %v1188_v20 = vrot.slane %v1186_v11, 5  ;;  %v551_v21 = vshll.u32 %v2019_v7, 16  ;;  %v556_v22 = vshrl.u32 %v2020_v8, 16  ;;  %v1194_v29 = vrot.slane %v1192_v12, 5 }
  0x86   : > { %v411_v23 = vsel %vm2551_vm2, %v406_v14, %v410_v62  ;;  %v1176_v24 = vrot.slane %v1175_v15, 4  ;;  %v544_v25 = vrot.slane %v542_v16, 4  ;;  %v547_v26 = vrot.slane %v545_v17, 5  ;;  %v2188_v14 = vld [vmem:[%s2526_s30 + $0xc0] sm:$0xf] }
  0x87   : > { %v2005_v27 = vcombine.low %v397_v9, %v411_v23  ;;  %v1189_v28 = vor.u32 %v1188_v20, %v1185_v10  ;;  %v558_v30 = vrot.slane %v556_v22, 4  ;;  %v559_v35 = vshll.u32 %v2020_v8, 16  ;;  %v2186_v8 = vld [vmem:[%s2526_s30 + $0xb8] sm:$0xf]  ;;  %v2335_v15 = vld [vmem:[%s2526_s30 + $0xc0] ss:$8 sps:$4 sm:$0xff]  }
  0x88   : > { %270 = vrot.lane.b32.xlu0 %v2333_v2, %s2428_s5  ;;  %1083 = vrot.lane.b32.xlu1 %v2334_v3, %s2431_s8  ;;  %v1181_v32 = vsel %vm2551_vm2, %v1176_v24, %v1180_v6  ;;  %v548_v34 = vor.u32 %v547_v26, %v544_v25  ;;  %v565_v36 = vshll.u32 %v2021_v13, 16  ;;  %v1326_v39 = vshrl.u32 %v2142_v18, 16  ;;  %v2065_v2 = vld [vmem:[%s2526_s30 + $0xcc] sm:$0x1]  ;;  %v2187_v13 = vld [vmem:[%s2526_s30 + $0xbc] sm:$0x1] }
  0x89   : > { %v1190_v38 = vrot.slane %v1189_v28, 4  ;;  %v1329_v40 = vshll.u32 %v2142_v18, 16  ;;  %v1335_v41 = vshll.u32 %v2143_v19, 16  ;;  %v553_v43 = vrot.slane %v551_v21, 5  ;;  %v2189_v22 = vld [vmem:[%s2526_s30 + $0xc4] sm:$0x1] }
  0x8a   : > { %v549_v42 = vrot.slane %v548_v34, 4  ;;  %v561_v44 = vrot.slane %v559_v35, 5  ;;  %v1340_v45 = vshrl.u32 %v2144_v31, 16  ;;  %v1328_v47 = vrot.slane %v1326_v39, 4  ;;  %v2337_v39 = vld [vmem:[%s2526_s30 + $0x108] ss:$8 sps:$4 sm:$0xff]  }
  0x8b   : > { %v1195_v46 = vsel %vm2551_vm2, %v1190_v38, %v1194_v29  ;;  %v1331_v48 = vrot.slane %v1329_v40, 5  ;;  %v567_v51 = vrot.slane %v565_v36, 5  ;;  %v1337_v52 = vrot.slane %v1335_v41, 5  ;;  %v2082_v29 = vld [vmem:[%s2526_s30 + $0x108] sm:$0xf] }
  0x8c   : > { %430 = vrot.lane.b32.xlu0 %v2005_v27, %s2433_s10  ;;  %v2132_v49 = vcombine.low %v1181_v32, %v1195_v46  ;;  %v562_v50 = vor.u32 %v561_v44, %v558_v30  ;;  %v1342_v54 = vrot.slane %v1340_v45, 4  ;;  %v1343_v55 = vshll.u32 %v2144_v31, 16  ;;  %v2083_v36 = vld [vmem:[%s2526_s30 + $0x10c] sm:$0x1]  ;;  %v2336_v38 = vld [vmem:[%s2526_s30 + $0xb8] ss:$8 sps:$4 sm:$0xff]  }
  0x8d   : > { %v1332_v53 = vor.u32 %v1331_v48, %v1328_v47  ;;  %v1349_v56 = vshll.u32 %v2145_v37, 16  ;;  %v554_v58 = vsel %vm2551_vm2, %v549_v42, %v553_v43  ;;  %v791_v62 = vshrl.u32 %v2062_v57, 16  ;;  %v2084_v43 = vld [vmem:[%s2526_s30 + $0x110] sm:$0xf]  ;;  %v2085_v48 = vld [vmem:[%s2526_s30 + $0x114] sm:$0x1] }
  0x8e   : > { %1240 = vrot.lane.b32.xlu1 %v2132_v49, %s2436_s19  ;;  %v563_v59 = vrot.slane %v562_v50, 4  ;;  %v1345_v0 = vrot.slane %v1343_v55, 5  ;;  %v794_v3 = vshll.u32 %v2062_v57, 16  ;;  %v800_v6 = vshll.u32 %v2063_v60, 16  ;;  %v2206_v49 = vld [vmem:[%s2526_s30 + $0x100] sm:$0xf] }
  0x8f   : > { %v1333_v63 = vrot.slane %v1332_v53, 4  ;;  %v1351_v1 = vrot.slane %v1349_v56, 5  ;;  %v793_v5 = vrot.slane %v791_v62, 4  ;;  %v805_v7 = vshrl.u32 %v2064_v61, 16  ;;  %v2797_v30 = vpop.permute.xlu0 %264  ;;  %v2208_v55 = vld [vmem:[%s2526_s30 + $0x108] sm:$0xf]  ;;  %v2813_v56 = vpop.permute.xlu1 %627 }
  0x90   : > { %v568_v4 = vsel %vm2551_vm2, %v563_v59, %v567_v51  ;;  %v1346_v11 = vor.u32 %v1345_v0, %v1342_v54  ;;  %v796_v12 = vrot.slane %v794_v3, 5  ;;  %v802_v16 = vrot.slane %v800_v6, 5  ;;  %v2207_v54 = vld [vmem:[%s2526_s30 + $0x104] sm:$0x1] }
  0x91   : > { %v2025_v9 = vcombine.low %v554_v58, %v568_v4  ;;  %v1338_v10 = vsel %vm2551_vm2, %v1333_v63, %v1337_v52  ;;  %v807_v17 = vrot.slane %v805_v7, 4  ;;  %v808_v18 = vshll.u32 %v2064_v61, 16 }
  0x92   : > { %v814_v19 = vshll.u32 %v2065_v2, 16  ;;  %v1347_v20 = vrot.slane %v1346_v11, 4  ;;  %v797_v21 = vor.u32 %v796_v12, %v793_v5  ;;  %v1575_v23 = vshrl.u32 %v2186_v8, 16  ;;  %v2338_v2 = vld [vmem:[%s2526_s30 + $0x100] ss:$8 sps:$4 sm:$0xff]  }
  0x93   : > { %587 = vrot.lane.b32.xlu0 %v2025_v9, %s2432_s9  ;;  %v1578_v24 = vshll.u32 %v2186_v8, 16  ;;  %v810_v25 = vrot.slane %v808_v18, 5  ;;  %v1584_v27 = vshll.u32 %v2187_v13, 16  ;;  %v1589_v28 = vshrl.u32 %v2188_v14, 16  ;;  %v2209_v12 = vld [vmem:[%s2526_s30 + $0x10c] sm:$0x1] }
  0x94   : > { %v816_v26 = vrot.slane %v814_v19, 5  ;;  %v1352_v31 = vsel %vm2551_vm2, %v1347_v20, %v1351_v1  ;;  %v798_v32 = vrot.slane %v797_v21, 4  ;;  %v1577_v34 = vrot.slane %v1575_v23, 4  ;;  %v2817_v1 = vpop.permute.xlu0 %673  ;;  %v2126_v20 = vld [vmem:[%s2526_s30 + $0x38] sm:$0xf]  ;;  %v2826_v21 = vpop.permute.xlu1 %1033 }
  0x95   : > { %v1580_v35 = vrot.slane %v1578_v24, 5  ;;  %v2152_v37 = vcombine.low %v1338_v10, %v1352_v31  ;;  %v811_v40 = vor.u32 %v810_v25, %v807_v17  ;;  %v1586_v41 = vrot.slane %v1584_v27, 5 }
  0x96   : > { %v1591_v42 = vrot.slane %v1589_v28, 4  ;;  %v803_v44 = vsel %vm2551_vm2, %v798_v32, %v802_v16  ;;  %v1592_v46 = vshll.u32 %v2188_v14, 16  ;;  %v1598_v47 = vshll.u32 %v2189_v22, 16  ;;  %v2128_v32 = vld [vmem:[%s2526_s30 + $0x40] sm:$0xf] }
  0x97   : > { %633 = vrot.lane.b32.xlu0 %v2335_v15, %s2427_s4  ;;  %v1581_v45 = vor.u32 %v1580_v35, %v1577_v34  ;;  %1397 = vrot.lane.b32.xlu1 %v2152_v37, %s2437_s21  ;;  %v812_v50 = vrot.slane %v811_v40, 4  ;;  %v948_v51 = vshrl.u32 %v2082_v29, 16  ;;  %v951_v52 = vshll.u32 %v2082_v29, 16  ;;  %v2129_v37 = vld [vmem:[%s2526_s30 + $0x44] sm:$0x1] }
  0x98   : > { %v957_v53 = vshll.u32 %v2083_v36, 16  ;;  %v1594_v58 = vrot.slane %v1592_v46, 5  ;;  %v1600_v59 = vrot.slane %v1598_v47, 5  ;;  %v962_v60 = vshrl.u32 %v2084_v43, 16  ;;  %v2836_v34 = vpop.permute.xlu0 %266 }
  0x99   : > { %v1582_v57 = vrot.slane %v1581_v45, 4  ;;  %v817_v61 = vsel %vm2551_vm2, %v812_v50, %v816_v26  ;;  %v950_v62 = vrot.slane %v948_v51, 4  ;;  %v953_v63 = vrot.slane %v951_v52, 5  ;;  %v2127_v26 = vld [vmem:[%s2526_s30 + $0x3c] sm:$0x1] }
  0x9a   : > { %v959_v0 = vrot.slane %v957_v53, 5  ;;  %v2069_v3 = vcombine.low %v803_v44, %v817_v61  ;;  %v1595_v5 = vor.u32 %v1594_v58, %v1591_v42  ;;  %v964_v6 = vrot.slane %v962_v60, 4  ;;  %v2146_v44 = vld [vmem:[%s2526_s30 + $0x80] sm:$0xf] }
  0x9b   : > { %679 = vrot.lane.b32.xlu0 %v2337_v39, %s2430_s7  ;;  %v1587_v4 = vsel %vm2551_vm2, %v1582_v57, %v1586_v41  ;;  %1443 = vrot.lane.b32.xlu1 %v2336_v38, %s2438_s23  ;;  %v954_v7 = vor.u32 %v953_v63, %v950_v62  ;;  %v965_v8 = vshll.u32 %v2084_v43, 16  ;;  %v971_v9 = vshll.u32 %v2085_v48, 16  ;;  %v2149_v62 = vld [vmem:[%s2526_s30 + $0x8c] sm:$0x1] }
  0x9c   : > { %v1732_v10 = vshrl.u32 %v2206_v49, 16  ;;  %v1596_v11 = vrot.slane %v1595_v5, 4  ;;  %v1735_v13 = vshll.u32 %v2206_v49, 16  ;;  %v1741_v14 = vshll.u32 %v2207_v54, 16  ;;  %v2147_v49 = vld [vmem:[%s2526_s30 + $0x84] sm:$0x1] }
  0x9d   : > { %v1746_v15 = vshrl.u32 %v2208_v55, 16  ;;  %v955_v16 = vrot.slane %v954_v7, 4  ;;  %v967_v17 = vrot.slane %v965_v8, 5  ;;  %v973_v18 = vrot.slane %v971_v9, 5  ;;  %v2148_v54 = vld [vmem:[%s2526_s30 + $0x88] sm:$0xf] }
  0x9e   : > { %v1734_v19 = vrot.slane %v1732_v10, 4  ;;  %v1601_v22 = vsel %vm2551_vm2, %v1596_v11, %v1600_v59  ;;  %v1737_v23 = vrot.slane %v1735_v13, 5  ;;  %v1743_v24 = vrot.slane %v1741_v14, 5  ;;  %v2339_v59 = vld [vmem:[%s2526_s30 + $0x38] ss:$8 sps:$4 sm:$0xff]  }
  0x9f   : > { %836 = vrot.lane.b32.xlu0 %v2069_v3, %s2434_s11  ;;  %v1748_v25 = vrot.slane %v1746_v15, 4  ;;  %1489 = vrot.lane.b32.xlu1 %v2338_v2, %s2439_s26  ;;  %v2196_v27 = vcombine.low %v1587_v4, %v1601_v22  ;;  %v960_v28 = vsel %vm2551_vm2, %v955_v16, %v959_v0  ;;  %v968_v29 = vor.u32 %v967_v17, %v964_v6  ;;  %v425_v4 = vpop.permute.xlu0 %424  ;;  %v2340_v14 = vld [vmem:[%s2526_s30 + $0x80] ss:$8 sps:$4 sm:$0xff]  }
  0xa0   : > { %v1749_v31 = vshll.u32 %v2208_v55, 16  ;;  %v1738_v35 = vor.u32 %v1737_v23, %v1734_v19  ;;  %v1755_v36 = vshll.u32 %v2209_v12, 16  ;;  %v1197_v38 = vshrl.u32 %v2126_v20, 16  ;;  %v2845_v55 = vpop.permute.xlu1 %1079  ;;  %v2343_v23 = vld [vmem:[%s2526_s30] ss:$8 sps:$4 sm:$0xff]  }
  0xa1   : > { %v1200_v39 = vshll.u32 %v2126_v20, 16  ;;  %v969_v40 = vrot.slane %v968_v29, 4  ;;  %v1206_v42 = vshll.u32 %v2127_v26, 16  ;;  %v1211_v43 = vshrl.u32 %v2128_v32, 16  ;;  %v2190_v26 = vld [vmem:[%s2526_s30 + $0xc8] sm:$0xf] }
  0xa2   : > { %v1751_v41 = vrot.slane %v1749_v31, 5  ;;  %v1739_v45 = vrot.slane %v1738_v35, 4  ;;  %v1757_v46 = vrot.slane %v1755_v36, 5  ;;  %v1199_v47 = vrot.slane %v1197_v38, 4  ;;  %231 = vst.msk [vmem:[#allocation2] sm:$0xff] %vm230_vm3, %v2343_v23 }
  0xa3   : > { %v1202_v48 = vrot.slane %v1200_v39, 5  ;;  %1646 = vrot.lane.b32.xlu1 %v2196_v27, %s2440_s27  ;;  %v974_v50 = vsel %vm2551_vm2, %v969_v40, %v973_v18  ;;  %v1208_v52 = vrot.slane %v1206_v42, 5  ;;  %v1213_v53 = vrot.slane %v1211_v43, 4  ;;  %v2191_v31 = vld [vmem:[%s2526_s30 + $0xcc] sm:$0x1]  ;;  %277 = vst.msk [vmem:[#allocation2] sm:$0xff] %vm276_vm4, %v2797_v30 }
  0xa4   : > { %v1752_v51 = vor.u32 %v1751_v41, %v1748_v25  ;;  %v2089_v57 = vcombine.low %v960_v28, %v974_v50  ;;  %v1744_v58 = vsel %vm2551_vm2, %v1739_v45, %v1743_v24  ;;  %v1214_v61 = vshll.u32 %v2128_v32, 16  ;;  %v2858_v24 = vpop.permute.xlu1 %581  ;;  %v2193_v38 = vld [vmem:[%s2526_s30 + $0xd4] sm:$0x1]  ;;  %437 = vst.msk [vmem:[#allocation2] sm:$0xff] %vm436_vm5, %v425_v4 }
  0xa5   : > { %v1203_v60 = vor.u32 %v1202_v48, %v1199_v47  ;;  %v1220_v0 = vshll.u32 %v2129_v37, 16  ;;  %v1354_v2 = vshrl.u32 %v2146_v44, 16  ;;  %v1357_v3 = vshll.u32 %v2146_v44, 16  ;;  %v2192_v37 = vld [vmem:[%s2526_s30 + $0xd0] sm:$0xf]  ;;  %594 = vst.msk [vmem:[#allocation2] sm:$0xff] %vm593_vm6, %v2858_v24 }
  0xa6   : > { %v1753_v63 = vrot.slane %v1752_v51, 4  ;;  %993 = vrot.lane.b32.xlu0 %v2089_v57, %s2435_s18  ;;  %v1216_v6 = vrot.slane %v1214_v61, 5  ;;  %v1363_v7 = vshll.u32 %v2147_v49, 16  ;;  %v1368_v8 = vshrl.u32 %v2148_v54, 16  ;;  %v2341_v44 = vld [vmem:[%s2526_s30 + $0xc8] ss:$8 sps:$4 sm:$0xff]  }
  0xa7   : > { %v1204_v5 = vrot.slane %v1203_v60, 4  ;;  %v1222_v10 = vrot.slane %v1220_v0, 5  ;;  %v1356_v11 = vrot.slane %v1354_v2, 4  ;;  %v1359_v12 = vrot.slane %v1357_v3, 5  ;;  %v2211_v50 = vld [vmem:[%s2526_s30 + $0x114] sm:$0x1] }
  0xa8   : > { %v1758_v9 = vsel %vm2551_vm2, %v1753_v63, %v1757_v46  ;;  %v1217_v16 = vor.u32 %v1216_v6, %v1213_v53  ;;  %v1365_v17 = vrot.slane %v1363_v7, 5  ;;  %v1370_v19 = vrot.slane %v1368_v8, 4  ;;  %v2210_v46 = vld [vmem:[%s2526_s30 + $0x110] sm:$0xf]  ;;  %v2212_v53 = vld [vmem:[%s2526_s30 + $0x118] sm:$0xf] }
  0xa9   : > { %v2216_v13 = vcombine.low %v1744_v58, %v1758_v9  ;;  %v1209_v15 = vsel %vm2551_vm2, %v1204_v5, %v1208_v52  ;;  %v1360_v18 = vor.u32 %v1359_v12, %v1356_v11  ;;  %v1371_v20 = vshll.u32 %v2148_v54, 16  ;;  %v831_v58 = vpop.permute.xlu1 %830  ;;  %v2342_v6 = vld [vmem:[%s2526_s30 + $0x110] ss:$8 sps:$4 sm:$0xff]   ;;  %640 = vst.msk [vmem:[#allocation2] sm:$0xff] %vm639_vm7, %v2813_v56 }
  0xaa   : > { %v1377_v22 = vshll.u32 %v2149_v62, 16  ;;  %1039 = vrot.lane.b32.xlu0 %v2339_v59, %s2429_s6  ;;  %v1218_v25 = vrot.slane %v1217_v16, 4  ;;  %v1603_v32 = vshrl.u32 %v2190_v26, 16  ;;  %v2865_v35 = vpop.permute.xlu0 %987  ;;  %v1606_v39 = vshll.u32 %v2190_v26, 16  ;;  %v2213_v62 = vld [vmem:[%s2526_s30 + $0x11c] sm:$0x1] }
  0xab   : > { %1803 = vrot.lane.b32.xlu1 %v2216_v13, %s2441_s28  ;;  %v1361_v27 = vrot.slane %v1360_v18, 4  ;;  %v1373_v28 = vrot.slane %v1371_v20, 5  ;;  %v1612_v40 = vshll.u32 %v2191_v31, 16  ;;  %v1617_v48 = vshrl.u32 %v2192_v37, 16  ;;  %686 = vst.msk [vmem:[#allocation2] sm:$0xff] %vm685_vm8, %v2817_v1  ;;  %s185_s6 = sand.u32 1, %s2409_s13  }
  0xac   : > { %v1379_v29 = vrot.slane %v1377_v22, 5  ;;  %v1223_v36 = vsel %vm2551_vm2, %v1218_v25, %v1222_v10  ;;  %v1605_v45 = vrot.slane %v1603_v32, 4  ;;  %v1608_v30 = vrot.slane %v1606_v39, 5  ;;  %v2344_v10 = vld [vmem:[%s2526_s30 + $0x10] ss:$8 sps:$4 sm:$0xff]   ;;  %843 = vst.msk [vmem:[#allocation2] sm:$0xff] %vm842_vm9, %v831_v58 }
  0xad   : > { %v2133_v41 = vcombine.low %v1209_v15, %v1223_v36  ;;  %v1366_v42 = vsel %vm2551_vm2, %v1361_v27, %v1365_v17  ;;  %v1374_v43 = vor.u32 %v1373_v28, %v1370_v19  ;;  %v1614_v47 = vrot.slane %v1612_v40, 5  ;;  %232 = vst.msk [vmem:[#allocation2 + $0x8] sm:$0xff] %vm230_vm3, %v2344_v10  ;;  %v2345_v17 = vld [vmem:[%s2526_s30 + $0x20] ss:$8 sps:$4 sm:$0xff]   ;;  %v2346_v28 = vld [vmem:[%s2526_s30 + $0x30] ss:$8 sps:$4 sm:$0xff]  }
  0xae   : > { %v1620_v49 = vshll.u32 %v2192_v37, 16  ;;  %v1626_v52 = vshll.u32 %v2193_v38, 16  ;;  %v1760_v54 = vshrl.u32 %v2210_v46, 16  ;;  %v1763_v57 = vshll.u32 %v2210_v46, 16  ;;  %v427_v4 = vpop.permute.xlu0 %426  ;;  %278 = vst.msk [vmem:[#allocation2 + $0x8] sm:$0xff] %vm276_vm4, %v2836_v34  ;;  %s1984_s7 = sshll.u32 %s185_s6, 3 }
  0xaf   : > { %1085 = vrot.lane.b32.xlu1 %v2340_v14, %s2431_s8  ;;  %1242 = vrot.lane.b32.xlu0 %v2133_v41, %s2436_s19  ;;  %v1375_v51 = vrot.slane %v1374_v43, 4  ;;  %v1609_v59 = vor.u32 %v1608_v30, %v1605_v45  ;;  %v1619_v60 = vrot.slane %v1617_v48, 4  ;;  %v1769_v3 = vshll.u32 %v2211_v50, 16  ;;  %438 = vst.msk [vmem:[#allocation2 + $0x8] sm:$0xff] %vm436_vm5, %v427_v4  ;;  %s2220_s8 = sshll.u32 %s2417_s15, 7  ;;  %s187_s9 = scalar_lea.vmem [#allocation3], %s1984_s7 }
  0xb0   : > { %v1622_v61 = vrot.slane %v1620_v49, 5  ;;  %v1762_v0 = vrot.slane %v1760_v54, 4  ;;  %v1765_v2 = vrot.slane %v1763_v57, 5  ;;  %v1628_v9 = vrot.slane %v1626_v52, 5  ;;  %233 = vst.msk [vmem:[#allocation2 + $0x10] sm:$0xff] %vm230_vm3, %v2345_v17  ;;  %234 = vst.msk [vmem:[#allocation2 + $0x18] sm:$0xff] %vm230_vm3, %v2346_v28  ;;  %s2991_s19 = scalar_lea.hbm %s3042_s3, %s2220_s8 }
  0xb1   : > { %v1380_v63 = vsel %vm2551_vm2, %v1375_v51, %v1379_v29  ;;  %v1610_v7 = vrot.slane %v1609_v59, 4  ;;  %v1774_v12 = vshrl.u32 %v2212_v53, 16  ;;  %v1777_v13 = vshll.u32 %v2212_v53, 16  ;;  %1000 = vst.msk [vmem:[#allocation2] sm:$0xff] %vm999_vm10, %v2865_v35  ;;  %s1902_s10 = sshll.u32 %s187_s9, 4  ;;  %s1888_s15 = scalar_lea.sflag [#allocation4], %s185_s6  ;;  %s2993_s10 = int_to_ptr.vmem [resolvable:$true] %s1902_s10 }
  0xb2   : > { %v2153_v5 = vcombine.low %v1366_v42, %v1380_v63  ;;  %v1623_v8 = vor.u32 %v1622_v61, %v1619_v60  ;;  %v1766_v11 = vor.u32 %v1765_v2, %v1762_v0  ;;  %v1783_v14 = vshll.u32 %v2213_v62, 16  ;;  %1046 = vst.msk [vmem:[#allocation2] sm:$0xff] %vm1045_vm11, %v2826_v21 }
  0xb3   : > { %1445 = vrot.lane.b32.xlu0 %v2341_v44, %s2438_s23  ;;  %v1615_v15 = vsel %vm2551_vm2, %v1610_v7, %v1614_v47  ;;  %v1771_v19 = vrot.slane %v1769_v3, 5  ;;  %v1776_v20 = vrot.slane %v1774_v12, 4  ;;  %v1779_v22 = vrot.slane %v1777_v13, 5  ;;  %1092 = vst.msk [vmem:[#allocation2] sm:$0xff] %vm1091_vm12, %v2845_v55  ;;  %v1821_v55 = vld [vmem:[%s3041_s2] sm:$0xff]  ;;  %s2445_s23 = smov [#allocation3]  }
  0xb4   : > { %1399 = vrot.lane.b32.xlu1 %v2153_v5, %s2437_s21  ;;  %v1624_v16 = vrot.slane %v1623_v8, 4  ;;  %v1767_v18 = vrot.slane %v1766_v11, 4  ;;  %v1237_v23 = vpop.permute.xlu1 %1236  ;;  %v1785_v27 = vrot.slane %v1783_v14, 5  ;;  %v2442_v36 = vmov 0.0   ;;  %s2347_s21 = scalar_lea.vmem %s2993_s10, 128 }
  0xb5   : > { %v1780_v34 = vor.u32 %v1779_v22, %v1776_v20  ;;  %2228 = vmatprep.subr.bf16.mxu0 %v2442_v36  ;;  %2236 = vmatprep.mubr.msk.bf16.mxu0 %vm2443_vm15, %v2442_v36  ;;  %1249 = vst.msk [vmem:[#allocation2] sm:$0xff] %vm1248_vm13, %v1237_v23  ;;  %v2444_v37 = vmov 0   ;;  %vm1811_vm3 = vcmask 523744   ;;  %vm1827_vm15 = vcmask 523264   ;;  %p2348_p12 = scmp.ne.s32.totalorder %s2993_s10, %s2347_s21 }
  0xb6   : > { %v1629_v25 = vsel %vm2551_vm2, %v1624_v16, %v1628_v9  ;;  %v1772_v56 = vsel %vm2551_vm2, %v1767_v18, %v1771_v19  ;;  %2314 = vset.pattern.permute.xlu0 %v2444_v37 }
  0xb7   : > { %v2197_v26 = vcombine.low %v1615_v15, %v1629_v25  ;;  %v1781_v29 = vrot.slane %v1780_v34, 4  ;;  %p2349_p13 = pnand %p2348_p12, %p2506_p4 }
  0xb8   : > { %1491 = vrot.lane.b32.xlu1 %v2342_v6, %s2439_s26  ;;  %s2351_s26 = sshll.u32 %s2445_s23, 4  ;;  %s2352_s26 = int_to_ptr.vmem [resolvable:$false] %s2351_s26 }
  0xb9   : > { %v584_v24 = vpop.permute.xlu0 %583  ;;  %1648 = vrot.lane.b32.xlu0 %v2197_v26, %s2440_s27  ;;  %v1786_v1 = vsel %vm2551_vm2, %v1781_v29, %v1785_v27  ;;  %vm1654_vm2 = vcmask 490944   ;;  %p2350_p0 = pneg %p2349_p13  ;;  %s2353_s27 = scalar_lea.vmem %s2352_s26, 256 }
  0xba   : > { %595 = vst.msk [vmem:[#allocation2 + $0x8] sm:$0xff] %vm593_vm6, %v584_v24  ;;  %v2217_v35 = vcombine.low %v1772_v56, %v1786_v1  ;;  %v1816_v24 = vld [vmem:[%s3040_s1] sm:$0xf]  ;;  %p2354_p1 = scmp.lt.s32.totalorder %s2993_s10, %s2352_s26  ;;  %p2355_p2 = scmp.lt.s32.totalorder %s2353_s27, %s2347_s21 }
  0xbc   : > { %1805 = vrot.lane.b32.xlu1 %v2217_v35, %s2441_s28  ;;  %p2356_p3 = por %p2355_p2, %p2354_p1 }
  0xbd   : > { %v1394_v31 = vpop.permute.xlu1 %1393  ;;  %v630_v32 = vpop.permute.xlu0 %629  ;;  %1824 = vperm.xlu0 %2314, %v1821_v55  }
  0xbe   : > { %641 = vst.msk [vmem:[#allocation2 + $0x8] sm:$0xff] %vm639_vm7, %v630_v32  ;;  %p2357_p5 = pnand %p2356_p3, %p2350_p0 }
  0xbf   : > { %1406 = vst.msk [vmem:[#allocation2] sm:$0xff] %vm1405_vm14, %v1394_v31 }
  0xc1   : > { %v1440_v33 = vpop.permute.xlu1 %1439  ;;  %v676_v21 = vpop.permute.xlu0 %675 }
  0xc2   : > { %1452 = vst.msk [vmem:[#allocation2] sm:$0xff] %vm1451_vm0, %v1440_v33 }
  0xc3   : > { %687 = vst.msk [vmem:[#allocation2 + $0x8] sm:$0xff] %vm685_vm8, %v676_v21 }
  0xc5   : > { %v1486_v38 = vpop.permute.xlu1 %1485  ;;  %v833_v39 = vpop.permute.xlu0 %832 }
  0xc6   : > { %1498 = vst.msk [vmem:[#allocation2] sm:$0xff] %vm1497_vm1, %v1486_v38 }
  0xc7   : > { %844 = vst.msk [vmem:[#allocation2 + $0x8] sm:$0xff] %vm842_vm9, %v833_v39 }
  0xc9   : > { %v1643_v40 = vpop.permute.xlu1 %1642 }
  0xca   : > { %1655 = vst.msk [vmem:[#allocation2] sm:$0xff] %vm1654_vm2, %v1643_v40 }
  0xcc   : > { %v990_v41 = vpop.permute.xlu0 %989 }
  0xcd   : > { %1001 = vst.msk [vmem:[#allocation2 + $0x8] sm:$0xff] %vm999_vm10, %v990_v41 }
  0xd0   : > { %v1036_v42 = vpop.permute.xlu0 %1035 }
  0xd1   : > { %v1800_v43 = vpop.permute.xlu1 %1799  ;;  %1047 = vst.msk [vmem:[#allocation2 + $0x8] sm:$0xff] %vm1045_vm11, %v1036_v42 }
  0xd2   : > { %1812 = vst.msk [vmem:[#allocation2] sm:$0xff] %vm1811_vm3, %v1800_v43 }
  0xd4   : > { %v1082_v44 = vpop.permute.xlu0 %1081 }
  0xd5   : > { %v269_v45 = vpop.permute.xlu1 %268  ;;  %1093 = vst.msk [vmem:[#allocation2 + $0x8] sm:$0xff] %vm1091_vm12, %v1082_v44 }
  0xd6   : > { %279 = vst.msk [vmem:[#allocation2 + $0x10] sm:$0xff] %vm276_vm4, %v269_v45 }
  0xd9   : > { %v429_v46 = vpop.permute.xlu1 %428  ;;  %v1817_v30 = vld [vmem:[#allocation2] sm:$0xff] }
  0xda   : > { %439 = vst.msk [vmem:[#allocation2 + $0x10] sm:$0xff] %vm436_vm5, %v429_v46  ;;  %v1832_v47 = vsel %vm1827_vm15, %v1817_v30, 0  ;;  %v1239_v48 = vpop.permute.xlu0 %1238 }
  0xdb   : > { %2229 = vmatpush3.bf16.xpose.msra.mxu0 %v1832_v47  ;;  %1250 = vst.msk [vmem:[#allocation2 + $0x8] sm:$0xff] %vm1248_vm13, %v1239_v48 }
  0xdc   : > { %2230 = vmatprep.subr.bf16.mxu0 %v2442_v36 }
  0xdf   : > { %v586_v49 = vpop.permute.xlu1 %585 }
  0xe0   : > { %596 = vst.msk [vmem:[#allocation2 + $0x10] sm:$0xff] %vm593_vm6, %v586_v49 }
  0xe3   : > { %v632_v50 = vpop.permute.xlu1 %631  ;;  %v1396_v51 = vpop.permute.xlu0 %1395 }
  0xe4   : > { %642 = vst.msk [vmem:[#allocation2 + $0x10] sm:$0xff] %vm639_vm7, %v632_v50 }
  0xe5   : > { %1407 = vst.msk [vmem:[#allocation2 + $0x8] sm:$0xff] %vm1405_vm14, %v1396_v51 }
  0xe7   : > { %v678_v52 = vpop.permute.xlu1 %677  ;;  %v1442_v53 = vpop.permute.xlu0 %1441 }
  0xe8   : > { %688 = vst.msk [vmem:[#allocation2 + $0x10] sm:$0xff] %vm685_vm8, %v678_v52 }
  0xe9   : > { %1453 = vst.msk [vmem:[#allocation2 + $0x8] sm:$0xff] %vm1451_vm0, %v1442_v53 }
  0xeb   : > { %v835_v54 = vpop.permute.xlu1 %834  ;;  %v1488_v57 = vpop.permute.xlu0 %1487 }
  0xec   : > { %845 = vst.msk [vmem:[#allocation2 + $0x10] sm:$0xff] %vm842_vm9, %v835_v54 }
  0xed   : > { %1499 = vst.msk [vmem:[#allocation2 + $0x8] sm:$0xff] %vm1497_vm1, %v1488_v57 }
  0xef   : > { %v1645_v58 = vpop.permute.xlu0 %1644 }
  0xf0   : > { %1656 = vst.msk [vmem:[#allocation2 + $0x8] sm:$0xff] %vm1654_vm2, %v1645_v58 }
  0xf2   : > { %v992_v59 = vpop.permute.xlu1 %991 }
  0xf3   : > { %1002 = vst.msk [vmem:[#allocation2 + $0x10] sm:$0xff] %vm999_vm10, %v992_v59 }
  0xf6   : > { %v1802_v60 = vpop.permute.xlu0 %1801  ;;  %v1038_v61 = vpop.permute.xlu1 %1037 }
  0xf7   : > { %1813 = vst.msk [vmem:[#allocation2 + $0x8] sm:$0xff] %vm1811_vm3, %v1802_v60 }
  0xf8   : > { %1048 = vst.msk [vmem:[#allocation2 + $0x10] sm:$0xff] %vm1045_vm11, %v1038_v61 }
  0xfa   : > { %v271_v62 = vpop.permute.xlu0 %270  ;;  %v1084_v63 = vpop.permute.xlu1 %1083 }
  0xfb   : > { %280 = vst.msk [vmem:[#allocation2 + $0x18] sm:$0xff] %vm276_vm4, %v271_v62 }
  0xfc   : > { %1094 = vst.msk [vmem:[#allocation2 + $0x10] sm:$0xff] %vm1091_vm12, %v1084_v63 }
  0xfe   : > { %v431_v0 = vpop.permute.xlu0 %430  ;;  %v1818_v2 = vld [vmem:[#allocation2 + $0x8] sm:$0xff] }
  0xff   : > { %440 = vst.msk [vmem:[#allocation2 + $0x18] sm:$0xff] %vm436_vm5, %v431_v0  ;;  %v1835_v3 = vsel %vm1827_vm15, %v1818_v2, 0 }
 0x100   : > { %v1241_v4 = vpop.permute.xlu1 %1240  ;;  %2231 = vmatpush3.bf16.xpose.msra.mxu0 %v1835_v3 }
 0x101   : > { %1251 = vst.msk [vmem:[#allocation2 + $0x10] sm:$0xff] %vm1248_vm13, %v1241_v4  ;;  %2232 = vmatprep.subr.bf16.mxu0 %v2442_v36 }
 0x105   : > { %v588_v5 = vpop.permute.xlu0 %587 }
 0x106   : > { %597 = vst.msk [vmem:[#allocation2 + $0x18] sm:$0xff] %vm593_vm6, %v588_v5 }
 0x109   : > { %v634_v6 = vpop.permute.xlu0 %633  ;;  %v1398_v7 = vpop.permute.xlu1 %1397 }
 0x10a   : > { %643 = vst.msk [vmem:[#allocation2 + $0x18] sm:$0xff] %vm639_vm7, %v634_v6 }
 0x10b   : > { %1408 = vst.msk [vmem:[#allocation2 + $0x10] sm:$0xff] %vm1405_vm14, %v1398_v7 }
 0x10d   : > { %v680_v8 = vpop.permute.xlu0 %679  ;;  %v1444_v9 = vpop.permute.xlu1 %1443 }
 0x10e   : > { %689 = vst.msk [vmem:[#allocation2 + $0x18] sm:$0xff] %vm685_vm8, %v680_v8 }
 0x10f   : > { %1454 = vst.msk [vmem:[#allocation2 + $0x10] sm:$0xff] %vm1451_vm0, %v1444_v9 }
 0x111   : > { %v837_v10 = vpop.permute.xlu0 %836  ;;  %v1490_v11 = vpop.permute.xlu1 %1489 }
 0x112   : > { %846 = vst.msk [vmem:[#allocation2 + $0x18] sm:$0xff] %vm842_vm9, %v837_v10 }
 0x113   : > { %1500 = vst.msk [vmem:[#allocation2 + $0x10] sm:$0xff] %vm1497_vm1, %v1490_v11 }
 0x115   : > { %v1647_v12 = vpop.permute.xlu1 %1646 }
 0x116   : > { %1657 = vst.msk [vmem:[#allocation2 + $0x10] sm:$0xff] %vm1654_vm2, %v1647_v12 }
 0x118   : > { %v994_v13 = vpop.permute.xlu0 %993 }
 0x119   : > { %1003 = vst.msk [vmem:[#allocation2 + $0x18] sm:$0xff] %vm999_vm10, %v994_v13 }
 0x11c   : > { %v1040_v15 = vpop.permute.xlu0 %1039 }
 0x11d   : > { %v1804_v14 = vpop.permute.xlu1 %1803  ;;  %1049 = vst.msk [vmem:[#allocation2 + $0x18] sm:$0xff] %vm1045_vm11, %v1040_v15 }
 0x11e   : > { %1814 = vst.msk [vmem:[#allocation2 + $0x10] sm:$0xff] %vm1811_vm3, %v1804_v14 }
 0x121   : > { %v1086_v16 = vpop.permute.xlu1 %1085  ;;  %v1243_v17 = vpop.permute.xlu0 %1242 }
 0x122   : > { %1095 = vst.msk [vmem:[#allocation2 + $0x18] sm:$0xff] %vm1091_vm12, %v1086_v16 }
 0x123   : > { %1252 = vst.msk [vmem:[#allocation2 + $0x18] sm:$0xff] %vm1248_vm13, %v1243_v17 }
 0x125   : > { %v1819_v18 = vld [vmem:[#allocation2 + $0x10] sm:$0xff]  ;;  %v1446_v20 = vpop.permute.xlu0 %1445 }
 0x126   : > { %v1838_v19 = vsel %vm1827_vm15, %v1819_v18, 0  ;;  %v1400_v22 = vpop.permute.xlu1 %1399 }
 0x127   : > { %2233 = vmatpush3.bf16.xpose.msra.mxu0 %v1838_v19  ;;  %1409 = vst.msk [vmem:[#allocation2 + $0x18] sm:$0xff] %vm1405_vm14, %v1400_v22 }
 0x128   : > { %2234 = vmatprep.subr.bf16.mxu0 %v2442_v36  ;;  %1455 = vst.msk [vmem:[#allocation2 + $0x18] sm:$0xff] %vm1451_vm0, %v1446_v20 }
 0x12a   : > { %v1492_v23 = vpop.permute.xlu1 %1491 }
 0x12b   : > { %1501 = vst.msk [vmem:[#allocation2 + $0x18] sm:$0xff] %vm1497_vm1, %v1492_v23  ;;  %v1649_v25 = vpop.permute.xlu0 %1648 }
 0x12c   : > { %1658 = vst.msk [vmem:[#allocation2 + $0x18] sm:$0xff] %vm1654_vm2, %v1649_v25 }
 0x12e   : > { %v1806_v26 = vpop.permute.xlu1 %1805 }
 0x12f   : > { %1815 = vst.msk [vmem:[#allocation2 + $0x18] sm:$0xff] %vm1811_vm3, %v1806_v26 }
 0x136   : > { %v1820_v34 = vld [vmem:[#allocation2 + $0x18] sm:$0xff] }
 0x137   : > { %v1841_v27 = vsel %vm1827_vm15, %v1820_v34, 0 }
 0x138   : > { %2235 = vmatpush3.bf16.xpose.msra.mxu0 %v1841_v27 }
 0x13c   : > { %v1825_v28 = vpop.permute.xlu0 %1824 }
 0x13f   : > { %2237 = vmatmul.mubr.msk.bf16.vlgmr.msra.gmra.mrb[0].mxu0 %vm1827_vm15, %v1816_v24 }
 0x212   : > { %v1877_v56 = vpop.f32.mrb[0].mxu0 }
 0x213   : > { %v1878_v29 = vadd.f32 %v1877_v56, %v1825_v28  ;;  %v2238_v1 = vpop.f32.mrb[1].mxu0 }
 0x214   : > { %v1880_v31 = vpop.f32.mrb[2].mxu0 }
 0x215   : > { %vm1883_vm4 = vcmp.ge.f32.partialorder %v1878_v29, 0.0  ;;  %v1884_v32 = vmul.f32 0.2, %v1878_v29  ;;  %v2239_v36 = vpop.f32.mrb[3].mxu0 }
 0x217   : > { %v1885_v35 = vsel %vm1883_vm4, %v1878_v29, %v1884_v32 }
 0x218   : > { %1886 = vst.msk [vmem:[%s187_s9] sm:$0xff] %vm1827_vm15, %v1885_v35 }
 0x219   : > { %2360 = shalt.err (!%p2357_p5)
}
 0x21a   : > { %s2361_s28 = scalar_lea.hbm %s2991_s19, 128  ;;  %s2365_s4 = scalar_lea.hbm %s3042_s3, 256 }
 0x21b   : > { %p2362_p6 = scmp.ne.s32.totalorder %s2991_s19, %s2361_s28  ;;  %p2366_p10 = scmp.lt.u32.totalorder %s2991_s19, %s3042_s3 }
 0x21c   : > { %p2367_p11 = scmp.lt.u32.totalorder %s2365_s4, %s2361_s28  ;;  %p2369_p13 = scmp.lt.u32.totalorder %s2361_s28, %s2991_s19 }
 0x21d   : > { %p2363_p7 = pnand %p2362_p6, %p2506_p4 }
 0x21e   : > { %p2368_p12 = por %p2367_p11, %p2366_p10 }
 0x21f   : > { %p2364_p9 = pneg %p2363_p7 }
 0x220   : > { %p2370_p0 = por %p2369_p13, %p2368_p12 }
 0x222   : > { %p2371_p1 = pnand %p2370_p0, %p2364_p9 }
 0x224   : > { %2374 = shalt.err (!%p2371_p1)
}
 0x225   : > { %2241 = dma.vmem_to_hbm [thread:$0]  (%p2506_p4), %s2993_s10, 128, %s2991_s19, %s1888_s15  }
 0x226 PF: > { %p2247_p2 = scmp.ge.s32.totalorder %s2425_s17, 2  ;;  %s1914_s7 = sand.u32 1, %s2405_s12  }
 0x227   : > { %s1915_s8 = scalar_lea.sflag [#allocation4], %s1914_s7 }
 0x228   : > { %p2244_p3 = pnand %p2247_p2, %p2513_p8 }
 0x22a   : > { %2400 = dma.done.wait (!%p2244_p3), %s1915_s8, 128  }
 0x22b   : > { %2402 = vsyncadd (!%p2244_p3), %s1915_s8, 4294967168  ;;  %s16_s17 = sadd.s32 1, %s2425_s17   ;;  %s3047_s12 = smov %s2409_s13 }
 0x22c   : > { %p13_p5 = scmp.ge.s32.totalorder %s16_s17, 4   ;;  %s3048_s13 = smov %s2413_s14 }
 0x22d   : > { %s3049_s14 = smov %s2519_s25  ;;  %s3050_s15 = smov %s2421_s16 }
 0x22e   : > { %s3051_s16 = smov %s3053_s20  ;;  %15 = sbr.rel (!%p13_p5) target bundleno = 4 (0x4), region = 74 }
 0x235   :  { %1920 = vsyncpa [#allocation4], 1 }
 0x236   :  { %1922 = vsyncpa [#allocation4 + $0x1], 1 }

</bundles_post_ra>
